<compile_context>
chip_gen: v5e
topology: v5e:2x2
jax: 0.10.0
libtpu: 0.0.40
codegen_flags: <defaults>
</compile_context>

<pallas_src>
import functools

import jax
import jax.numpy as jnp
from jax import lax
from jax.experimental import pallas as pl
from jax.experimental.pallas import tpu as pltpu

TIME2VEC_ABSPOS_MULTIPLIER = 0.0001
TIME2VEC_AGE_MULTIPLIER = 0.01
TIME2VEC_MAX_CLIP = 100.0
TIME2VEC_MIN_CLIP = -100.0
LAYER_NORM_EPS = 1e-12

LANE = 128
SUBLANE = 8


def _round_up(x, m):
    return (x + m - 1) // m * m


def ehr_embeddings_kernel(hidden_size,
                          # scalar prefetch (SMEM)
                          ids_ref,
                          # tiled / resident VMEM inputs
                          seg_ref, age_ref, abspos_ref,
                          concept_hbm,            # (V, H_pad) f32, stays in HBM
                          seg_tab_ref,            # (T, H_pad) f32, VMEM-resident
                          age_w_ref, age_phi_ref,
                          abs_w_ref, abs_phi_ref,
                          ln_gamma_ref, ln_beta_ref,
                          # output
                          out_ref,                # (TILE_N, H_pad) f32
                          # scratch
                          gather_buf, dma_sem):
    tile_n, h_pad = out_ref.shape
    base = pl.program_id(0) * tile_n

    # --- 1) issue per-row DMA gathers for the concept embedding (HBM -> VMEM) ---
    @pl.loop(0, tile_n)
    def _issue(j):
        row = ids_ref[base + j]
        pltpu.make_async_copy(concept_hbm.at[row], gather_buf.at[j], dma_sem).start()

    # --- 2) overlap the gather DMAs with VPU / EUP work that doesn't need them ---
    col = lax.broadcasted_iota(jnp.int32, (1, h_pad), 1)   # row-shaped, broadcasts
    is_col0 = col == 0                                     # shared by both Time2Vec calls

    # segment embedding: select over the (tiny) type vocabulary on the VPU
    segs = seg_ref[...]                         # (tile_n, 1) int32
    seg_tab = seg_tab_ref[...]                  # (T, h_pad)
    seg_emb = seg_tab[0:1, :]
    for t in range(1, seg_tab.shape[0]):
        seg_emb = jnp.where(segs == t, seg_tab[t:t + 1, :], seg_emb)

    def time2vec(tau, w_row, phi_row, scale):
        # tau: (tile_n, 1); w_row/phi_row: (1, h_pad).
        # col 0 = clipped linear term, cols 1.. = cos periodic (init_scale on input).
        raw = (tau * scale) * w_row + phi_row
        lin = jnp.clip(raw, TIME2VEC_MIN_CLIP, TIME2VEC_MAX_CLIP)
        per = jnp.cos(raw)                      # EUP slot — effectively free
        return jnp.where(is_col0, lin, per)

    age_emb = time2vec(age_ref[...], age_w_ref[...], age_phi_ref[...],
                       TIME2VEC_AGE_MULTIPLIER)
    abs_emb = time2vec(abspos_ref[...], abs_w_ref[...], abs_phi_ref[...],
                       TIME2VEC_ABSPOS_MULTIPLIER)

    # config.linear == False => a = b = c = d = 1 (scales folded away)
    partial = seg_emb + age_emb + abs_emb

    if h_pad != hidden_size:
        valid = (col < hidden_size).astype(jnp.float32)    # (1, h_pad), in DMA shadow
    else:
        valid = None

    # --- 3) single aggregate wait: the row copies tile gather_buf exactly, so waiting
    #        for gather_buf's full byte count drains every per-row DMA on this sem.
    pltpu.make_async_copy(gather_buf, gather_buf, dma_sem).wait()

    emb = gather_buf[...] + partial             # (tile_n, h_pad)

    # --- 4) LayerNorm over the TRUE hidden dim (biased variance, nn.LayerNorm) ---
    inv_h = 1.0 / hidden_size
    if valid is not None:
        emb = emb * valid
        mu = jnp.sum(emb, axis=-1, keepdims=True) * inv_h
        diff = (emb - mu) * valid
        var = jnp.sum(diff * diff, axis=-1, keepdims=True) * inv_h
    else:
        mu = jnp.sum(emb, axis=-1, keepdims=True) * inv_h
        diff = emb - mu
        var = jnp.sum(diff * diff, axis=-1, keepdims=True) * inv_h

    normed = diff * lax.rsqrt(var + LAYER_NORM_EPS)
    out_ref[...] = normed * ln_gamma_ref[...] + ln_beta_ref[...]
    # dropout: identity in eval mode (no-op)


def _pad_last(x, target):
    pad = target - x.shape[-1]
    if pad == 0:
        return x
    return jnp.pad(x, [(0, 0)] * (x.ndim - 1) + [(0, pad)])


def ehr_embeddings(input_ids, token_type_ids, position_ids, params, *, tile_n=256):
    """input_ids/token_type_ids: (B, S) int; position_ids: {'age','abspos'}: (B, S).
    Returns (B, S, H) float32."""
    assert tile_n % SUBLANE == 0
    B, S = input_ids.shape
    N = B * S
    V, H = params["concept_table"].shape
    T = params["segment_table"].shape[0]

    H_pad = max(LANE, _round_up(H, LANE))        # lane-dense output blocks
    tile = min(tile_n, _round_up(N, SUBLANE))
    N_pad = _round_up(N, tile)
    grid = (N_pad // tile,)

    # flatten + pad per-token inputs; padded tokens use id 0 / zeros and are sliced off
    ids_flat = jnp.pad(input_ids.reshape(N).astype(jnp.int32), (0, N_pad - N))
    seg2 = jnp.pad(token_type_ids.reshape(N, 1).astype(jnp.int32), ((0, N_pad - N), (0, 0)))
    age2 = jnp.pad(position_ids["age"].reshape(N, 1).astype(jnp.float32), ((0, N_pad - N), (0, 0)))
    abs2 = jnp.pad(position_ids["abspos"].reshape(N, 1).astype(jnp.float32), ((0, N_pad - N), (0, 0)))

    # zero-pad the hidden dim of all parameters; LayerNorm is masked in-kernel
    concept = _pad_last(params["concept_table"], H_pad)
    segment = _pad_last(params["segment_table"], H_pad)
    age_w, age_phi = _pad_last(params["age_w"], H_pad), _pad_last(params["age_phi"], H_pad)
    abs_w, abs_phi = _pad_last(params["abspos_w"], H_pad), _pad_last(params["abspos_phi"], H_pad)
    gamma, beta = _pad_last(params["ln_gamma"], H_pad), _pad_last(params["ln_beta"], H_pad)

    tok_spec = pl.BlockSpec((tile, 1), lambda i, ids: (i, 0))
    row_spec = pl.BlockSpec((1, H_pad), lambda i, ids: (0, 0))     # resident, not re-DMA'd

    grid_spec = pltpu.PrefetchScalarGridSpec(
        num_scalar_prefetch=1,                   # ids -> SMEM, drive the DMA gather
        grid=grid,
        in_specs=[
            tok_spec,                            # token_type_ids
            tok_spec,                            # age
            tok_spec,                            # abspos
            pl.BlockSpec(memory_space=pl.ANY),   # concept table stays in HBM
            pl.BlockSpec((T, H_pad), lambda i, ids: (0, 0)),   # segment table (resident)
            row_spec, row_spec,                  # age w / phi
            row_spec, row_spec,                  # abspos w / phi
            row_spec, row_spec,                  # ln gamma / beta
        ],
        out_specs=pl.BlockSpec((tile, H_pad), lambda i, ids: (i, 0)),
        scratch_shapes=[
            pltpu.VMEM((tile, H_pad), jnp.float32),   # gather destination
            pltpu.SemaphoreType.DMA,                  # shared gather semaphore
        ],
    )

    cost = pl.CostEstimate(
        flops=int(30 * N_pad * H_pad),
        transcendentals=int(2 * N_pad * H_pad),
        bytes_accessed=int(2 * N_pad * H_pad * 4 + 3 * N_pad * 4 + (T + 6) * H_pad * 4),
    )

    out = pl.pallas_call(
        functools.partial(ehr_embeddings_kernel, H),
        out_shape=jax.ShapeDtypeStruct((N_pad, H_pad), jnp.float32),
        grid_spec=grid_spec,
        compiler_params=pltpu.CompilerParams(
            dimension_semantics=("parallel",),   # v7x: shard token tiles across 2 TCs
            vmem_limit_bytes=48 * 1024 * 1024,   # fits v7x's 64 MiB VMEM with headroom
        ),
        cost_estimate=cost,
    )(ids_flat, seg2, age2, abs2,
      concept, segment,
      age_w, age_phi, abs_w, abs_phi,
      gamma, beta)

    return out[:N, :H].reshape(B, S, H)


def init_params(key, vocab_size, type_vocab_size, hidden_size):
    ks = jax.random.split(key, 8)
    H = hidden_size
    # Time2Vec params packed as (1, H): col 0 = (w0, phi0), cols 1.. = (w, phi)
    return {
        "concept_table": jax.random.normal(ks[0], (vocab_size, H), jnp.float32) * 0.02,
        "segment_table": jax.random.normal(ks[1], (type_vocab_size, H), jnp.float32) * 0.02,
        "age_w": jax.random.normal(ks[2], (1, H), jnp.float32),
        "age_phi": jax.random.normal(ks[3], (1, H), jnp.float32),
        "abspos_w": jax.random.normal(ks[4], (1, H), jnp.float32),
        "abspos_phi": jax.random.normal(ks[5], (1, H), jnp.float32),
        "ln_gamma": jnp.ones((1, H), jnp.float32),
        "ln_beta": jnp.zeros((1, H), jnp.float32),
    }


def _reference(input_ids, token_type_ids, position_ids, params):
    """Pure-JAX reference of the same forward pass for a correctness check."""
    concept = params["concept_table"][input_ids]                 # (B, S, H)
    segment = params["segment_table"][token_type_ids]            # (B, S, H)

    def t2v(tau, w_row, phi_row, scale):
        tau = (tau * scale)[..., None]                           # (B, S, 1)
        raw = tau * w_row[0] + phi_row[0]                        # (B, S, H)
        lin = jnp.clip(raw[..., :1], TIME2VEC_MIN_CLIP, TIME2VEC_MAX_CLIP)
        per = jnp.cos(raw[..., 1:])
        return jnp.concatenate([lin, per], axis=-1)

    age_emb = t2v(position_ids["age"].astype(jnp.float32),
                  params["age_w"], params["age_phi"], TIME2VEC_AGE_MULTIPLIER)
    abs_emb = t2v(position_ids["abspos"].astype(jnp.float32),
                  params["abspos_w"], params["abspos_phi"], TIME2VEC_ABSPOS_MULTIPLIER)

    emb = concept + segment + age_emb + abs_emb
    mu = jnp.mean(emb, axis=-1, keepdims=True)
    var = jnp.mean((emb - mu) ** 2, axis=-1, keepdims=True)
    normed = (emb - mu) / jnp.sqrt(var + LAYER_NORM_EPS)
    return normed * params["ln_gamma"][0] + params["ln_beta"][0]


if __name__ == "__main__":
    B, S, H = 2, 8, 32
    VOCAB, TYPE_VOCAB = 100, 4

    key = jax.random.PRNGKey(0)
    k_par, k_ids, k_seg, k_age, k_abs = jax.random.split(key, 5)

    params = init_params(k_par, VOCAB, TYPE_VOCAB, H)
    input_ids = jax.random.randint(k_ids, (B, S), 0, VOCAB, dtype=jnp.int32)
    token_type_ids = jax.random.randint(k_seg, (B, S), 0, TYPE_VOCAB, dtype=jnp.int32)
    position_ids = {
        "age": jax.random.uniform(k_age, (B, S), jnp.float32, 0.0, 100.0),
        "abspos": jax.random.uniform(k_abs, (B, S), jnp.float32, 0.0, 10000.0),
    }

    out = jax.block_until_ready(ehr_embeddings(input_ids, token_type_ids, position_ids, params))
    ref = _reference(input_ids, token_type_ids, position_ids, params)
    assert out.shape == (B, S, H)
    assert jnp.allclose(out, ref, atol=1e-4, rtol=1e-4), "mismatch vs JAX reference"

    # second config: exercises multi-tile grid, padded tokens, and padded hidden dim
    B2, S2 = 4, 40
    k2 = jax.random.split(jax.random.PRNGKey(1), 4)
    ids2 = jax.random.randint(k2[0], (B2, S2), 0, VOCAB, dtype=jnp.int32)
    segs2 = jax.random.randint(k2[1], (B2, S2), 0, TYPE_VOCAB, dtype=jnp.int32)
    pos2 = {
        "age": jax.random.uniform(k2[2], (B2, S2), jnp.float32, 0.0, 100.0),
        "abspos": jax.random.uniform(k2[3], (B2, S2), jnp.float32, 0.0, 10000.0),
    }
    out2 = jax.block_until_ready(ehr_embeddings(ids2, segs2, pos2, params, tile_n=64))
    ref2 = _reference(ids2, segs2, pos2, params)
    assert jnp.allclose(out2, ref2, atol=1e-4, rtol=1e-4), "mismatch vs JAX reference (cfg 2)"

    print("KERNEL_OK")
</pallas_src>

<mosaic_0001>
module attributes {stable_mosaic.version = 11 : i64} {
  func.func @ehr_embeddings_kernel(%arg0: i32, %arg1: memref<16xi32, #tpu.memory_space<smem>>, %arg2: memref<16x1xi32, #tpu.memory_space<vmem>>, %arg3: memref<16x1xf32, #tpu.memory_space<vmem>>, %arg4: memref<16x1xf32, #tpu.memory_space<vmem>>, %arg5: memref<100x128xf32, #tpu.memory_space<any>>, %arg6: memref<4x128xf32, #tpu.memory_space<vmem>>, %arg7: memref<1x128xf32, #tpu.memory_space<vmem>>, %arg8: memref<1x128xf32, #tpu.memory_space<vmem>>, %arg9: memref<1x128xf32, #tpu.memory_space<vmem>>, %arg10: memref<1x128xf32, #tpu.memory_space<vmem>>, %arg11: memref<1x128xf32, #tpu.memory_space<vmem>>, %arg12: memref<1x128xf32, #tpu.memory_space<vmem>>, %arg13: memref<16x128xf32, #tpu.memory_space<vmem>>, %arg14: memref<16x128xf32, #tpu.memory_space<vmem>>, %arg15: memref<!tpu.dma_semaphore, #tpu.memory_space<semaphore_mem>>) attributes {dimension_semantics = [#tpu.dimension_semantics<parallel>], iteration_bounds = array<i64: 1>, scalar_prefetch = 1 : i64, scratch_operands = 2 : i64, tpu.core_type = #tpu.core_type<tc>, window_params = [{transform_indices = @transform_0, window_bounds = array<i64: 16, 1>}, {transform_indices = @transform_1, window_bounds = array<i64: 16, 1>}, {transform_indices = @transform_2, window_bounds = array<i64: 16, 1>}, {}, {pipeline_mode = #tpu.pipeline_mode<synchronous>, transform_indices = @transform_4, window_bounds = array<i64: 4, 128>}, {pipeline_mode = #tpu.pipeline_mode<synchronous>, transform_indices = @transform_5, window_bounds = array<i64: 1, 128>}, {pipeline_mode = #tpu.pipeline_mode<synchronous>, transform_indices = @transform_6, window_bounds = array<i64: 1, 128>}, {pipeline_mode = #tpu.pipeline_mode<synchronous>, transform_indices = @transform_7, window_bounds = array<i64: 1, 128>}, {pipeline_mode = #tpu.pipeline_mode<synchronous>, transform_indices = @transform_8, window_bounds = array<i64: 1, 128>}, {pipeline_mode = #tpu.pipeline_mode<synchronous>, transform_indices = @transform_9, window_bounds = array<i64: 1, 128>}, {pipeline_mode = #tpu.pipeline_mode<synchronous>, transform_indices = @transform_10, window_bounds = array<i64: 1, 128>}, {transform_indices = @transform_11, window_bounds = array<i64: 16, 128>}]} {
    %c16_i32 = arith.constant 16 : i32
    %0 = arith.muli %arg0, %c16_i32 : i32
    %c0_i32 = arith.constant 0 : i32
    %c16_i32_0 = arith.constant 16 : i32
    %1 = arith.addi %c0_i32, %c16_i32_0 : i32
    %c1_i32 = arith.constant 1 : i32
    scf.for %arg16 = %c0_i32 to %1 step %c1_i32  : i32 {
      %c1_i32_37 = arith.constant 1 : i32
      %105 = arith.muli %arg16, %c1_i32_37 : i32
      %c0_i32_38 = arith.constant 0 : i32
      %106 = arith.addi %c0_i32_38, %105 : i32
      %107 = arith.addi %0, %106 : i32
      %108 = arith.index_cast %107 : i32 to index
      %109 = memref.load %arg1[%108] : memref<16xi32, #tpu.memory_space<smem>>
      %c0_i32_39 = arith.constant 0 : i32
      %110 = tpu.memref_slice %arg5[%109, %c0_i32_39] : memref<100x128xf32, #tpu.memory_space<any>> -> memref<1x128xf32, #tpu.memory_space<any>>
      %111 = tpu.memref_squeeze %110 : memref<1x128xf32, #tpu.memory_space<any>> -> memref<128xf32, #tpu.memory_space<any>>
      %c0_i32_40 = arith.constant 0 : i32
      %112 = tpu.memref_slice %arg14[%106, %c0_i32_40] : memref<16x128xf32, #tpu.memory_space<vmem>> -> memref<1x128xf32, #tpu.memory_space<vmem>>
      %113 = tpu.memref_squeeze %112 : memref<1x128xf32, #tpu.memory_space<vmem>> -> memref<128xf32, #tpu.memory_space<vmem>>
      tpu.enqueue_dma source(%111 : memref<128xf32, #tpu.memory_space<any>>) target(%113 : memref<128xf32, #tpu.memory_space<vmem>>) target_semaphore(%arg15 : memref<!tpu.dma_semaphore, #tpu.memory_space<semaphore_mem>>)
    }
    %c16_i32_1 = arith.constant 16 : i32
    %2 = tpu.iota {dimensions = array<i32: 1>} : vector<1x128xi32>
    %c0_i32_2 = arith.constant 0 : i32
    %3 = vector.broadcast %c0_i32_2 : i32 to vector<1x128xi32>
    %4 = arith.cmpi eq, %2, %3 : vector<1x128xi32>
    %c0 = arith.constant 0 : index
    %c0_3 = arith.constant 0 : index
    %5 = vector.load %arg2[%c0, %c0_3] : memref<16x1xi32, #tpu.memory_space<vmem>>, vector<16x1xi32>
    %c0_4 = arith.constant 0 : index
    %c0_5 = arith.constant 0 : index
    %6 = vector.load %arg6[%c0_4, %c0_5] : memref<4x128xf32, #tpu.memory_space<vmem>>, vector<4x128xf32>
    %7 = vector.extract_strided_slice %6 {offsets = [0, 0], sizes = [1, 128], strides = [1, 1]} : vector<4x128xf32> to vector<1x128xf32>
    %c1_i32_6 = arith.constant 1 : i32
    %8 = vector.broadcast %c1_i32_6 : i32 to vector<16x1xi32>
    %9 = arith.cmpi eq, %5, %8 : vector<16x1xi32>
    %10 = vector.extract_strided_slice %6 {offsets = [1, 0], sizes = [1, 128], strides = [1, 1]} : vector<4x128xf32> to vector<1x128xf32>
    %11 = vector.shape_cast %9 : vector<16x1xi1> to vector<16x1xi1>
    %12 = vector.broadcast %11 : vector<16x1xi1> to vector<16x128xi1>
    %13 = vector.shape_cast %10 : vector<1x128xf32> to vector<1x128xf32>
    %14 = vector.broadcast %13 : vector<1x128xf32> to vector<16x128xf32>
    %15 = vector.shape_cast %7 : vector<1x128xf32> to vector<1x128xf32>
    %16 = vector.broadcast %15 : vector<1x128xf32> to vector<16x128xf32>
    %17 = arith.select %12, %14, %16 : vector<16x128xi1>, vector<16x128xf32>
    %c2_i32 = arith.constant 2 : i32
    %18 = vector.broadcast %c2_i32 : i32 to vector<16x1xi32>
    %19 = arith.cmpi eq, %5, %18 : vector<16x1xi32>
    %20 = vector.extract_strided_slice %6 {offsets = [2, 0], sizes = [1, 128], strides = [1, 1]} : vector<4x128xf32> to vector<1x128xf32>
    %21 = vector.shape_cast %19 : vector<16x1xi1> to vector<16x1xi1>
    %22 = vector.broadcast %21 : vector<16x1xi1> to vector<16x128xi1>
    %23 = vector.shape_cast %20 : vector<1x128xf32> to vector<1x128xf32>
    %24 = vector.broadcast %23 : vector<1x128xf32> to vector<16x128xf32>
    %25 = arith.select %22, %24, %17 : vector<16x128xi1>, vector<16x128xf32>
    %c3_i32 = arith.constant 3 : i32
    %26 = vector.broadcast %c3_i32 : i32 to vector<16x1xi32>
    %27 = arith.cmpi eq, %5, %26 : vector<16x1xi32>
    %28 = vector.extract_strided_slice %6 {offsets = [3, 0], sizes = [1, 128], strides = [1, 1]} : vector<4x128xf32> to vector<1x128xf32>
    %29 = vector.shape_cast %27 : vector<16x1xi1> to vector<16x1xi1>
    %30 = vector.broadcast %29 : vector<16x1xi1> to vector<16x128xi1>
    %31 = vector.shape_cast %28 : vector<1x128xf32> to vector<1x128xf32>
    %32 = vector.broadcast %31 : vector<1x128xf32> to vector<16x128xf32>
    %33 = arith.select %30, %32, %25 : vector<16x128xi1>, vector<16x128xf32>
    %c0_7 = arith.constant 0 : index
    %c0_8 = arith.constant 0 : index
    %34 = vector.load %arg3[%c0_7, %c0_8] : memref<16x1xf32, #tpu.memory_space<vmem>>, vector<16x1xf32>
    %c0_9 = arith.constant 0 : index
    %c0_10 = arith.constant 0 : index
    %35 = vector.load %arg7[%c0_9, %c0_10] : memref<1x128xf32, #tpu.memory_space<vmem>>, vector<1x128xf32>
    %c0_11 = arith.constant 0 : index
    %c0_12 = arith.constant 0 : index
    %36 = vector.load %arg8[%c0_11, %c0_12] : memref<1x128xf32, #tpu.memory_space<vmem>>, vector<1x128xf32>
    %cst = arith.constant 0.00999999977 : f32
    %37 = vector.broadcast %cst : f32 to vector<16x1xf32>
    %38 = arith.mulf %34, %37 : vector<16x1xf32>
    %39 = vector.broadcast %38 : vector<16x1xf32> to vector<16x128xf32>
    %40 = vector.broadcast %35 : vector<1x128xf32> to vector<16x128xf32>
    %41 = arith.mulf %39, %40 : vector<16x128xf32>
    %42 = vector.broadcast %36 : vector<1x128xf32> to vector<16x128xf32>
    %43 = arith.addf %41, %42 : vector<16x128xf32>
    %cst_13 = arith.constant -1.000000e+02 : f32
    %cst_14 = arith.constant 1.000000e+02 : f32
    %44 = vector.broadcast %cst_13 : f32 to vector<16x128xf32>
    %45 = arith.maximumf %44, %43 : vector<16x128xf32>
    %46 = vector.broadcast %cst_14 : f32 to vector<16x128xf32>
    %47 = arith.minimumf %46, %45 : vector<16x128xf32>
    %48 = math.cos %43 : vector<16x128xf32>
    %49 = vector.shape_cast %4 : vector<1x128xi1> to vector<1x128xi1>
    %50 = vector.broadcast %49 : vector<1x128xi1> to vector<16x128xi1>
    %51 = arith.select %50, %47, %48 : vector<16x128xi1>, vector<16x128xf32>
    %c0_15 = arith.constant 0 : index
    %c0_16 = arith.constant 0 : index
    %52 = vector.load %arg4[%c0_15, %c0_16] : memref<16x1xf32, #tpu.memory_space<vmem>>, vector<16x1xf32>
    %c0_17 = arith.constant 0 : index
    %c0_18 = arith.constant 0 : index
    %53 = vector.load %arg9[%c0_17, %c0_18] : memref<1x128xf32, #tpu.memory_space<vmem>>, vector<1x128xf32>
    %c0_19 = arith.constant 0 : index
    %c0_20 = arith.constant 0 : index
    %54 = vector.load %arg10[%c0_19, %c0_20] : memref<1x128xf32, #tpu.memory_space<vmem>>, vector<1x128xf32>
    %cst_21 = arith.constant 9.99999974E-5 : f32
    %55 = vector.broadcast %cst_21 : f32 to vector<16x1xf32>
    %56 = arith.mulf %52, %55 : vector<16x1xf32>
    %57 = vector.broadcast %56 : vector<16x1xf32> to vector<16x128xf32>
    %58 = vector.broadcast %53 : vector<1x128xf32> to vector<16x128xf32>
    %59 = arith.mulf %57, %58 : vector<16x128xf32>
    %60 = vector.broadcast %54 : vector<1x128xf32> to vector<16x128xf32>
    %61 = arith.addf %59, %60 : vector<16x128xf32>
    %cst_22 = arith.constant -1.000000e+02 : f32
    %cst_23 = arith.constant 1.000000e+02 : f32
    %62 = vector.broadcast %cst_22 : f32 to vector<16x128xf32>
    %63 = arith.maximumf %62, %61 : vector<16x128xf32>
    %64 = vector.broadcast %cst_23 : f32 to vector<16x128xf32>
    %65 = arith.minimumf %64, %63 : vector<16x128xf32>
    %66 = math.cos %61 : vector<16x128xf32>
    %67 = vector.shape_cast %4 : vector<1x128xi1> to vector<1x128xi1>
    %68 = vector.broadcast %67 : vector<1x128xi1> to vector<16x128xi1>
    %69 = arith.select %68, %65, %66 : vector<16x128xi1>, vector<16x128xf32>
    %70 = arith.addf %33, %51 : vector<16x128xf32>
    %71 = arith.addf %70, %69 : vector<16x128xf32>
    %c32_i32 = arith.constant 32 : i32
    %72 = vector.broadcast %c32_i32 : i32 to vector<1x128xi32>
    %73 = arith.cmpi slt, %2, %72 : vector<1x128xi32>
    %74 = arith.extui %73 : vector<1x128xi1> to vector<1x128xi32>
    %75 = arith.sitofp %74 : vector<1x128xi32> to vector<1x128xf32>
    tpu.wait_dma2 semaphore(%arg15 : memref<!tpu.dma_semaphore, #tpu.memory_space<semaphore_mem>>) src(%arg14 : memref<16x128xf32, #tpu.memory_space<vmem>>) dst(%arg14 : memref<16x128xf32, #tpu.memory_space<vmem>>)
    %c0_24 = arith.constant 0 : index
    %c0_25 = arith.constant 0 : index
    %76 = vector.load %arg14[%c0_24, %c0_25] : memref<16x128xf32, #tpu.memory_space<vmem>>, vector<16x128xf32>
    %77 = arith.addf %76, %71 : vector<16x128xf32>
    %78 = vector.broadcast %75 : vector<1x128xf32> to vector<16x128xf32>
    %79 = arith.mulf %77, %78 : vector<16x128xf32>
    %cst_26 = arith.constant dense<0.000000e+00> : vector<16xf32>
    %80 = vector.multi_reduction <add>, %79, %cst_26 [1] : vector<16x128xf32> to vector<16xf32>
    %81 = vector.shape_cast %80 : vector<16xf32> to vector<16x1xf32>
    %cst_27 = arith.constant 3.125000e-02 : f32
    %82 = vector.broadcast %cst_27 : f32 to vector<16x1xf32>
    %83 = arith.mulf %81, %82 : vector<16x1xf32>
    %84 = vector.broadcast %83 : vector<16x1xf32> to vector<16x128xf32>
    %85 = arith.subf %79, %84 : vector<16x128xf32>
    %86 = vector.broadcast %75 : vector<1x128xf32> to vector<16x128xf32>
    %87 = arith.mulf %85, %86 : vector<16x128xf32>
    %88 = arith.mulf %87, %87 : vector<16x128xf32>
    %cst_28 = arith.constant dense<0.000000e+00> : vector<16xf32>
    %89 = vector.multi_reduction <add>, %88, %cst_28 [1] : vector<16x128xf32> to vector<16xf32>
    %90 = vector.shape_cast %89 : vector<16xf32> to vector<16x1xf32>
    %cst_29 = arith.constant 3.125000e-02 : f32
    %91 = vector.broadcast %cst_29 : f32 to vector<16x1xf32>
    %92 = arith.mulf %90, %91 : vector<16x1xf32>
    %cst_30 = arith.constant 9.99999996E-13 : f32
    %93 = vector.broadcast %cst_30 : f32 to vector<16x1xf32>
    %94 = arith.addf %92, %93 : vector<16x1xf32>
    %95 = math.rsqrt %94 : vector<16x1xf32>
    %96 = vector.broadcast %95 : vector<16x1xf32> to vector<16x128xf32>
    %97 = arith.mulf %87, %96 : vector<16x128xf32>
    %c0_31 = arith.constant 0 : index
    %c0_32 = arith.constant 0 : index
    %98 = vector.load %arg11[%c0_31, %c0_32] : memref<1x128xf32, #tpu.memory_space<vmem>>, vector<1x128xf32>
    %99 = vector.broadcast %98 : vector<1x128xf32> to vector<16x128xf32>
    %100 = arith.mulf %97, %99 : vector<16x128xf32>
    %c0_33 = arith.constant 0 : index
    %c0_34 = arith.constant 0 : index
    %101 = vector.load %arg12[%c0_33, %c0_34] : memref<1x128xf32, #tpu.memory_space<vmem>>, vector<1x128xf32>
    %102 = vector.broadcast %101 : vector<1x128xf32> to vector<16x128xf32>
    %103 = arith.addf %100, %102 : vector<16x128xf32>
    %c0_35 = arith.constant 0 : index
    %c0_36 = arith.constant 0 : index
    %104 = vector.load %arg13[%c0_35, %c0_36] : memref<16x128xf32, #tpu.memory_space<vmem>>, vector<16x128xf32>
    tpu.vector_store %arg13[%c0_35, %c0_36], %103 {strides = array<i32>} : memref<16x128xf32, #tpu.memory_space<vmem>>, vector<16x128xf32>,
    return
  }
  func.func @transform_0(%arg0: i32, %arg1: memref<16xi32, #tpu.memory_space<smem>>) -> (i32, i32) {
    %c0_i32 = arith.constant 0 : i32
    %c0_i32_0 = arith.constant 0 : i32
    return %arg0, %c0_i32 : i32, i32
  }
  func.func @transform_1(%arg0: i32, %arg1: memref<16xi32, #tpu.memory_space<smem>>) -> (i32, i32) {
    %c0_i32 = arith.constant 0 : i32
    %c0_i32_0 = arith.constant 0 : i32
    return %arg0, %c0_i32 : i32, i32
  }
  func.func @transform_2(%arg0: i32, %arg1: memref<16xi32, #tpu.memory_space<smem>>) -> (i32, i32) {
    %c0_i32 = arith.constant 0 : i32
    %c0_i32_0 = arith.constant 0 : i32
    return %arg0, %c0_i32 : i32, i32
  }
  func.func @transform_4(%arg0: i32, %arg1: memref<16xi32, #tpu.memory_space<smem>>) -> (i32, i32) {
    %c0_i32 = arith.constant 0 : i32
    %c0_i32_0 = arith.constant 0 : i32
    %c0_i32_1 = arith.constant 0 : i32
    return %c0_i32, %c0_i32_0 : i32, i32
  }
  func.func @transform_5(%arg0: i32, %arg1: memref<16xi32, #tpu.memory_space<smem>>) -> (i32, i32) {
    %c0_i32 = arith.constant 0 : i32
    %c0_i32_0 = arith.constant 0 : i32
    %c0_i32_1 = arith.constant 0 : i32
    return %c0_i32, %c0_i32_0 : i32, i32
  }
  func.func @transform_6(%arg0: i32, %arg1: memref<16xi32, #tpu.memory_space<smem>>) -> (i32, i32) {
    %c0_i32 = arith.constant 0 : i32
    %c0_i32_0 = arith.constant 0 : i32
    %c0_i32_1 = arith.constant 0 : i32
    return %c0_i32, %c0_i32_0 : i32, i32
  }
  func.func @transform_7(%arg0: i32, %arg1: memref<16xi32, #tpu.memory_space<smem>>) -> (i32, i32) {
    %c0_i32 = arith.constant 0 : i32
    %c0_i32_0 = arith.constant 0 : i32
    %c0_i32_1 = arith.constant 0 : i32
    return %c0_i32, %c0_i32_0 : i32, i32
  }
  func.func @transform_8(%arg0: i32, %arg1: memref<16xi32, #tpu.memory_space<smem>>) -> (i32, i32) {
    %c0_i32 = arith.constant 0 : i32
    %c0_i32_0 = arith.constant 0 : i32
    %c0_i32_1 = arith.constant 0 : i32
    return %c0_i32, %c0_i32_0 : i32, i32
  }
  func.func @transform_9(%arg0: i32, %arg1: memref<16xi32, #tpu.memory_space<smem>>) -> (i32, i32) {
    %c0_i32 = arith.constant 0 : i32
    %c0_i32_0 = arith.constant 0 : i32
    %c0_i32_1 = arith.constant 0 : i32
    return %c0_i32, %c0_i32_0 : i32, i32
  }
  func.func @transform_10(%arg0: i32, %arg1: memref<16xi32, #tpu.memory_space<smem>>) -> (i32, i32) {
    %c0_i32 = arith.constant 0 : i32
    %c0_i32_0 = arith.constant 0 : i32
    %c0_i32_1 = arith.constant 0 : i32
    return %c0_i32, %c0_i32_0 : i32, i32
  }
  func.func @transform_11(%arg0: i32, %arg1: memref<16xi32, #tpu.memory_space<smem>>) -> (i32, i32) {
    %c0_i32 = arith.constant 0 : i32
    %c0_i32_0 = arith.constant 0 : i32
    return %arg0, %c0_i32 : i32, i32
  }
}

</mosaic_0001>

<bundles_post_ra>
// kernel: tpu_custom_call.1
= control target key start
LH: loop header
LB: loop body
LE: loop exit
PB: predicated region body
PF: predicated region fallthrough
CT: control target
= control target key end

     0   :  { %s1032_s24 = smov [#allocation5]   ;;  %s1751_s0 = inlined_call_operand.vmem [shape: s32[16], index: 0, kind: input, shape index: {}]   ;;  %s1752_s1 = inlined_call_operand.vmem [shape: s32[16,1], index: 1, kind: input, shape index: {}]   ;;  %s1753_s2 = inlined_call_operand.vmem [shape: f32[16,1], index: 2, kind: input, shape index: {}]   ;;  %s1754_s3 = inlined_call_operand.vmem [shape: f32[16,1], index: 3, kind: input, shape index: {}]   ;;  %s1755_s4 = inlined_call_operand.hbm [shape: f32[100,128], index: 4, kind: input, shape index: {}]   ;;  %s1756_s5 = inlined_call_operand.vmem [shape: f32[4,128], index: 5, kind: input, shape index: {}]   ;;  %s1757_s6 = inlined_call_operand.vmem [shape: f32[1,128], index: 6, kind: input, shape index: {}]   ;;  %s1758_s7 = inlined_call_operand.vmem [shape: f32[1,128], index: 7, kind: input, shape index: {}]   ;;  %s1759_s8 = inlined_call_operand.vmem [shape: f32[1,128], index: 8, kind: input, shape index: {}]   ;;  %s1760_s9 = inlined_call_operand.vmem [shape: f32[1,128], index: 9, kind: input, shape index: {}]   ;;  %s1761_s10 = inlined_call_operand.vmem [shape: f32[1,128], index: 10, kind: input, shape index: {}]   ;;  %s1762_s11 = inlined_call_operand.vmem [shape: f32[1,128], index: 11, kind: input, shape index: {}]   ;;  %s1763_s12 = inlined_call_operand.hbm [shape: f32[16,128], index: 12, kind: output, shape index: {}]  }
   0x1   :  { %s18_s23 = sshll.u32 %s1751_s0, 4  ;;  %s19_s23 = int_to_ptr.vmem [resolvable:$true] %s18_s23 }
   0x2   :  { %21 = dma.vmem_to_smem %s19_s23, 16, %s1032_s24, [#allocation4] }
   0x3   :  { %1022 = dma.done.wait [#allocation4], 16 }
   0x4   :  { %1023 = vsyncadd [#allocation4], 4294967280 }
   0x5   :  { %24 = sfence }
   0x6   :  { %25 = vsyncpa [#allocation7], 0  ;;  %s1113_s25 = smov 0  }
   0x7 LB: > { %s54_s26 = sld [smem:[#allocation5 + %s1030_s25]]  ;;  %s56_s27 = scalar_lea.vmem [#allocation2], %s1030_s25  ;;  %s1030_s25 = sphi %s1113_s25, %s52_s25  }
   0x8   : > { %s66_s28 = sshll.u32 %s56_s27, 4  ;;  %s974_s18 = scalar_lea.hbm %s1755_s4, 104  ;;  %s67_s28 = int_to_ptr.vmem [resolvable:$true] %s66_s28 }
   0xd   : > { %s55_s30 = scalar_lea.hbm %s1755_s4, %s54_s26 }
   0xe   : > { %s64_s13 = sshll.u32 %s55_s30, 4  ;;  %s65_s13 = int_to_ptr.hbm [resolvable:$true] %s64_s13 }
   0xf   : > { %s970_s14 = sshra.s32 %s65_s13, 4  ;;  %s971_s14 = int_to_ptr.hbm [resolvable:$true] %s970_s14 }
  0x10   : > { %s972_s15 = scalar_lea.hbm %s971_s14, 1  ;;  %p975_p1 = scmp.lt.s32.totalorder %s971_s14, %s1755_s4 }
  0x11   : > { %p973_p0 = scmp.ne.s32.totalorder %s971_s14, %s972_s15  ;;  %p976_p2 = scmp.lt.s32.totalorder %s974_s18, %s972_s15 }
  0x13   : > { %p977_p3 = por %p976_p2, %p975_p1 }
  0x15   : > { %p978_p4 = pnand %p977_p3, %p973_p0 }
  0x17   : > { %981 = shalt.err (!%p978_p4)  }
  0x18   : > { %s982_s21 = sshra.s32 %s67_s28, 4  ;;  %s1033_s23 = smov [#allocation2]   ;;  %s983_s21 = int_to_ptr.vmem [resolvable:$true] %s982_s21 }
  0x19   : > { %s984_s22 = scalar_lea.vmem %s983_s21, 1  ;;  %s986_s24 = scalar_lea.vmem %s1033_s23, 16 }
  0x1a   : > { %p985_p5 = scmp.ne.s32.totalorder %s983_s21, %s984_s22  ;;  %p987_p6 = scmp.lt.s32.totalorder %s983_s21, [#allocation2] }
  0x1b   : > { %p988_p7 = scmp.lt.s32.totalorder %s986_s24, %s984_s22 }
  0x1d   : > { %p989_p8 = por %p988_p7, %p987_p6 }
  0x1f   : > { %p990_p9 = pnand %p989_p8, %p985_p5 }
  0x21   : > { %993 = shalt.err (!%p990_p9)  }
  0x22   : > { %69 = dma.hbm_to_vmem [thread:$0]  %s65_s13, 16, %s67_s28, [#allocation3] }
  0x23   : > { %s52_s25 = sadd.s32 1, %s1030_s25  }
  0x24   : > { %p49_p10 = scmp.ge.s32.totalorder %s52_s25, 16  }
  0x25   :  { %v464_v0 = vld [vmem:[%s1754_s3] sm:$0xff] (%p49_p10)  ;;  %v1034_v2 = vmov (%p49_p10), 0   ;;  %v465_v5 = vld [vmem:[%s1754_s3 + $0x8] sm:$0xff] (%p49_p10) }
  0x26   :  { %51 = sbr.rel (!%p49_p10) target bundleno = 7 (0x7), region = 73  ;;  %v122_v1 = vld [vmem:[%s1753_s2] sm:$0xff] (%p49_p10)  ;;  %946 = vset.pattern.permute.xlu1 (%p49_p10), %v1034_v2  ;;  %945 = vset.pattern.permute.xlu0 (%p49_p10), %v1034_v2  ;;  %v468_v3 = vmul.f32 (%p49_p10), 0.0001, %v464_v0  ;;  %v123_v7 = vld [vmem:[%s1753_s2 + $0x8] sm:$0xff] (%p49_p10) }
  0x27   :  { %v126_v4 = vmul.f32 (%p49_p10), 0.01, %v122_v1  ;;  %947 = vset.pattern.permute.xlu2 (%p49_p10), %v1034_v2  ;;  %v73_v6 = vld [vmem:[%s1752_s1] sm:$0xff] (%p49_p10)  ;;  %v469_v9 = vmul.f32 (%p49_p10), 0.0001, %v465_v5  ;;  %v74_v10 = vld [vmem:[%s1752_s1 + $0x8] sm:$0xff] (%p49_p10) }
  0x28   :  { %472 = vperm.xlu1 (%p49_p10), %946, %v468_v3   ;;  %vm76_vm0 = vcmp.eq.s32.totalorder (%p49_p10), %v73_v6, 1  ;;  %v127_v11 = vmul.f32 (%p49_p10), 0.01, %v123_v7  ;;  %vm77_vm1 = vcmp.eq.s32.totalorder (%p49_p10), %v74_v10, 1  ;;  %vm93_vm2 = vcmp.eq.s32.totalorder (%p49_p10), %v74_v10, 2 }
  0x29   :  { %130 = vperm.xlu0 (%p49_p10), %945, %v126_v4   ;;  %v78_v8 = vsel (%p49_p10), %vm76_vm0, 1, %v1034_v2  ;;  %v79_v12 = vsel (%p49_p10), %vm77_vm1, 1, %v1034_v2  ;;  %vm92_vm3 = vcmp.eq.s32.totalorder (%p49_p10), %v73_v6, 2  ;;  %v95_v13 = vsel (%p49_p10), %vm93_vm2, 1, %v1034_v2  ;;  %v948_v17 = vld [vmem:[%s1759_s8] ss:$0 sm:$0xff] (%p49_p10) }
  0x2a   :  { %81 = vperm.xlu2 (%p49_p10), %947, %v78_v8   ;;  %v94_v14 = vsel (%p49_p10), %vm92_vm3, 1, %v1034_v2  ;;  %vm107_vm4 = vcmp.eq.s32.totalorder (%p49_p10), %v73_v6, 3  ;;  %vm108_vm5 = vcmp.eq.s32.totalorder (%p49_p10), %v74_v10, 3  ;;  %v950_v18 = vld [vmem:[%s1757_s6] ss:$0 sm:$0xff] (%p49_p10) }
  0x2b   :  { %v109_v15 = vsel %vm107_vm4, 1, %v1034_v2  ;;  %v110_v16 = vsel %vm108_vm5, 1, %v1034_v2  ;;  %v949_v19 = vld [vmem:[%s1760_s9] ss:$0 sm:$0xff] }
  0x2c   :  { %v951_v20 = vld [vmem:[%s1758_s7] ss:$0 sm:$0xff] }
  0x2d   :  { %v1190_v45 = vld [vmem:[%s1756_s5] sm:$0xf] }
  0x2e   :  { %v1765_v52 = vperm.slane %v1190_v45, 1  ;;  %v1766_v53 = vperm.slane %v1190_v45, 0  ;;  %v1764_v62 = vperm.slane %v1190_v45, 2  ;;  %v119_v1 = vperm.slane %v1190_v45, 3 }
  0x30   :  { %477 = vperm.xlu1 %946, %v469_v9  }
  0x31   :  { %135 = vperm.xlu0 %945, %v127_v11  }
  0x32   :  { %84 = vperm.xlu2 %947, %v79_v12   ;;  %v1035_v12 = vmov 2475754826  }
  0x38   :  { %100 = vperm.xlu1 %946, %v95_v13  }
  0x39   :  { %97 = vperm.xlu0 %945, %v94_v14   ;;  %v1036_v14 = vmov 2131351028  }
  0x3a   :  { %112 = vperm.xlu2 %947, %v109_v15  }
  0x41   :  { %115 = vperm.xlu0 %945, %v110_v16  }
  0x84   :  { %v82_v54 = vpop.permute.xlu2 %81 }
  0x85   :  { %vm86_vm8 = vcmp.eq.s32.totalorder %v82_v54, 1 }
  0x86   :  { %v90_v61 = vsel %vm86_vm8, %v1765_v52, %v1766_v53 }
  0x9a   :  { %v473_v21 = vpop.permute.xlu1 %472 }
  0x9b   :  { %v131_v22 = vpop.permute.xlu0 %130  ;;  %v483_v23 = vmul.f32 %v948_v17, %v473_v21 }
  0x9c   :  { %v141_v24 = vmul.f32 %v950_v18, %v131_v22 }
  0x9d   :  { %v1171_v25 = vadd.f32 %v949_v19, %v483_v23  ;;  %v1039_v23 = vmov 1326507024  }
  0x9e   :  { %v1173_v26 = vadd.f32 %v951_v20, %v141_v24 }
  0x9f   :  { %v497_v27 = vand.u32 2139095040, %v1171_v25  ;;  %v494_v30 = vand.u32 2147483647, %v1171_v25 }
  0xa0   :  { %v155_v28 = vand.u32 2139095040, %v1173_v26  ;;  %v152_v29 = vand.u32 2147483647, %v1173_v26  ;;  %v907_v3 = vclamps-f32 %v1173_v26, 100.0 }
  0xa1   :  { %v498_v31 = vshrl.u32 %v497_v27, 23  ;;  %v501_v40 = vand.u32 8388607, %v494_v30  ;;  %v1040_v27 = vmov 683565275  }
  0xa2   :  { %v156_v32 = vshrl.u32 %v155_v28, 23  ;;  %v478_v33 = vpop.permute.xlu1 %477  ;;  %v159_v35 = vand.u32 8388607, %v152_v29 }
  0xa3   :  { %v136_v34 = vpop.permute.xlu0 %135  ;;  %v917_v36 = vadd.s32 4294967169, %v498_v31  ;;  %v484_v38 = vmul.f32 %v948_v17, %v478_v33  ;;  %v502_v55 = vor.u32 8388608, %v501_v40  ;;  %v1037_v17 = vmov 2102212464  }
  0xa4   :  { %v909_v37 = vadd.s32 4294967169, %v156_v32  ;;  %v142_v39 = vmul.f32 %v950_v18, %v136_v34  ;;  %v160_v46 = vor.u32 8388608, %v159_v35 }
  0xa5   :  { %v504_v41 = vadd.s32 1, %v917_v36  ;;  %v1183_v43 = vadd.f32 %v949_v19, %v484_v38  ;;  %v1205_v63 = vshll.u32 %v502_v55, 8  ;;  %v1038_v19 = vmov 920167782  }
  0xa6   :  { %v162_v42 = vadd.s32 1, %v909_v37  ;;  %v1185_v44 = vadd.f32 %v951_v20, %v142_v39  ;;  %v1198_v57 = vshll.u32 %v160_v46, 8 }
  0xa7   :  { %vm505_vm6 = vcmp.gt.s32.totalorder %v504_v41, 0  ;;  %v651_v49 = vand.u32 2139095040, %v1183_v43  ;;  %v1226_v16 = vand.u32 65535, %v1205_v63  ;;  %v1235_v22 = vshrl.u32 %v1205_v63, 16 }
  0xa8   :  { %vm163_vm7 = vcmp.gt.s32.totalorder %v162_v42, 0  ;;  %v506_v47 = vsel %vm505_vm6, %v504_v41, 0  ;;  %v309_v50 = vand.u32 2139095040, %v1185_v44  ;;  %v1213_v4 = vand.u32 65535, %v1198_v57 }
  0xa9   :  { %v164_v48 = vsel %vm163_vm7, %v162_v42, 0  ;;  %v1196_v56 = vand.u32 31, %v506_v47  ;;  %v652_v58 = vshrl.u32 %v651_v49, 23  ;;  %v1216_v6 = vshrl.u32 %v506_v47, 5 }
  0xaa   :  { %v166_v51 = vand.u32 31, %v164_v48  ;;  %v310_v59 = vshrl.u32 %v309_v50, 23  ;;  %v1219_v9 = vshrl.u32 %v1198_v57, 16  ;;  %v1221_v10 = vshrl.u32 %v164_v48, 5 }
  0xab   :  { %v1208_v0 = vsub.s32 32, %v1196_v56  ;;  %v920_v7 = vadd.s32 4294967169, %v652_v58  ;;  %v98_v11 = vpop.permute.xlu0 %97  ;;  %v520_v18 = vshll.u32 %v1037_v17, %v1196_v56  ;;  %v523_v21 = vshll.u32 %v1038_v19, %v1196_v56 }
  0xac   :  { %v167_v60 = vsub.s32 32, %v166_v51  ;;  %v912_v8 = vadd.s32 4294967169, %v310_v59  ;;  %v169_v28 = vshll.u32 %v1040_v27, %v166_v51  ;;  %v172_v31 = vshll.u32 %v1035_v12, %v166_v51 }
  0xad   :  { %v521_v20 = vshrl.u32 %v1038_v19, %v1208_v0  ;;  %v524_v24 = vshrl.u32 %v1039_v23, %v1208_v0  ;;  %v658_v33 = vadd.s32 1, %v920_v7  ;;  %vm102_vm9 = vcmp.eq.s32.totalorder %v98_v11, 1 }
  0xae   :  { %v170_v13 = vshrl.u32 %v1035_v12, %v167_v60  ;;  %v173_v15 = vshrl.u32 %v1036_v14, %v167_v60  ;;  %v176_v32 = vshrl.u32 %v1037_v17, %v167_v60  ;;  %v316_v34 = vadd.s32 1, %v912_v8 }
  0xaf   :  { %v175_v35 = vshll.u32 %v1036_v14, %v166_v51  ;;  %v178_v38 = vshll.u32 %v1037_v17, %v166_v51  ;;  %v179_v39 = vshrl.u32 %v1038_v19, %v167_v60  ;;  %v1245_v40 = vor.u32 %v521_v20, %v520_v18 }
  0xb0   :  { %v171_v36 = vor.u32 %v170_v13, %v169_v28  ;;  %v174_v37 = vor.u32 %v173_v15, %v172_v31  ;;  %v181_v42 = vshll.u32 %v1038_v19, %v166_v51  ;;  %v182_v46 = vshrl.u32 %v1039_v23, %v167_v60 }
  0xb1   :  { %v177_v41 = vor.u32 %v176_v32, %v175_v35  ;;  %vm529_vm10 = vcmp.lt.s32.totalorder %v1216_v6, 4  ;;  %v1252_v47 = vsel %vm102_vm9, %v1764_v62, %v90_v61  ;;  %v168_v48 = vshrl.u32 %v1040_v27, %v167_v60 }
  0xb2   :  { %v180_v49 = vor.u32 %v179_v39, %v178_v38  ;;  %vm659_vm11 = vcmp.gt.s32.totalorder %v658_v33, 0  ;;  %v183_v50 = vor.u32 %v182_v46, %v181_v42  ;;  %vm184_vm12 = vcmp.lt.s32.totalorder %v1221_v10, 1 }
  0xb3   :  { %vm187_vm13 = vcmp.lt.s32.totalorder %v1221_v10, 4  ;;  %v525_v54 = vor.u32 %v524_v24, %v523_v21  ;;  %vm186_vm14 = vcmp.lt.s32.totalorder %v1221_v10, 3  ;;  %v192_v51 = vsel %vm184_vm12, %v171_v36, %v174_v37 }
  0xb4   :  { %v193_v55 = vsel %vm187_vm13, %v180_v49, 920167782  ;;  %v1263_v58 = vsel %vm529_vm10, %v1245_v40, 920167782  ;;  %vm317_vm15 = vcmp.gt.s32.totalorder %v316_v34, 0  ;;  %vm185_vm0 = vcmp.lt.s32.totalorder %v1221_v10, 2 }
  0xb5   :  { %v194_v59 = vsel %vm186_vm14, %v177_v41, %v193_v55  ;;  %v1268_v60 = vsel %vm659_vm11, %v658_v33, 0  ;;  %v196_v7 = vsel %vm184_vm12, %v174_v37, %v177_v41  ;;  %v197_v8 = vsel %vm187_vm13, %v183_v50, 1326507024 }
  0xb6   :  { %v195_v61 = vsel %vm185_vm0, %v192_v51, %v194_v59  ;;  %v189_v11 = vsel %vm187_vm13, %v177_v41, 2102212464  ;;  %v198_v13 = vsel %vm186_vm14, %v180_v49, %v197_v8  ;;  %v539_v20 = vsel %vm529_vm10, %v525_v54, 1326507024 }
  0xb7   :  { %v225_v15 = vand.u32 65535, %v195_v61  ;;  %v226_v18 = vshrl.u32 %v195_v61, 16  ;;  %v199_v21 = vsel %vm185_vm0, %v196_v7, %v198_v13  ;;  %v511_v24 = vshll.u32 %v1040_v27, %v1196_v56 }
  0xb8   :  { %v512_v28 = vshrl.u32 %v1035_v12, %v1208_v0  ;;  %v1284_v31 = vsel %vm317_vm15, %v316_v34, 0  ;;  %v203_v32 = vand.u32 65535, %v199_v21  ;;  %v204_v33 = vshrl.u32 %v199_v21, 16 }
  0xb9   :  { %v228_v35 = vmul.u32 %v226_v18, %v1213_v4  ;;  %v1288_v38 = vand.u32 31, %v1268_v60  ;;  %v188_v39 = vsel %vm184_vm12, %v168_v48, %v171_v36  ;;  %v190_v41 = vsel %vm186_vm14, %v174_v37, %v189_v11 }
  0xba   :  { %v229_v42 = vmul.u32 %v225_v15, %v1219_v9  ;;  %v206_v46 = vmul.u32 %v204_v33, %v1213_v4  ;;  %v207_v34 = vmul.u32 %v203_v32, %v1219_v9  ;;  %v227_v49 = vmul.u32 %v225_v15, %v1213_v4 }
  0xbb   :  { %v230_v50 = vmul.u32 %v226_v18, %v1219_v9  ;;  %v205_v54 = vmul.u32 %v203_v32, %v1213_v4  ;;  %v231_v51 = vshll.u32 %v228_v35, 16  ;;  %v1300_v55 = vor.u32 %v512_v28, %v511_v24 }
  0xbc   :  { %v514_v36 = vshll.u32 %v1035_v12, %v1196_v56  ;;  %v208_v37 = vmul.u32 %v204_v33, %v1219_v9  ;;  %v209_v48 = vshll.u32 %v206_v46, 16  ;;  %v211_v59 = vshll.u32 %v207_v34, 16 }
  0xbd   :  { %v233_v61 = vshll.u32 %v229_v42, 16  ;;  %vm235_vm1 = vc.u32 %v227_v49, %v231_v51  ;;  %v237_v7 = vadd.s32 %v231_v51, %v227_v49  ;;  %v515_v8 = vshrl.u32 %v1036_v14, %v1208_v0 }
  0xbe   :  { %v517_v11 = vshll.u32 %v1036_v14, %v1196_v56  ;;  %vm213_vm2 = vc.u32 %v205_v54, %v209_v48  ;;  %v215_v4 = vadd.s32 %v209_v48, %v205_v54  ;;  %v236_v13 = vsel %vm235_vm1, 1, %v1034_v2 }
  0xbf   :  { %v518_v15 = vshrl.u32 %v1037_v17, %v1208_v0  ;;  %v214_v9 = vsel %vm213_vm2, 1, %v1034_v2  ;;  %v232_v18 = vshrl.u32 %v228_v35, 16  ;;  %v238_v21 = vadd.s32 %v236_v13, %v230_v50 }
  0xc0   :  { %vm239_vm3 = vc.u32 %v237_v7, %v233_v61  ;;  %v216_v24 = vadd.s32 %v214_v9, %v208_v37  ;;  %vm217_vm4 = vc.u32 %v215_v4, %v211_v59  ;;  %v1314_v32 = vor.u32 %v515_v8, %v514_v36 }
  0xc1   :  { %v240_v28 = vsel %vm239_vm3, 1, %v1034_v2  ;;  %v218_v56 = vsel %vm217_vm4, 1, %v1034_v2  ;;  %v234_v33 = vshrl.u32 %v229_v42, 16  ;;  %v519_v54 = vor.u32 %v518_v15, %v517_v11 }
  0xc2   :  { %v242_v49 = vadd.s32 %v240_v28, %v238_v21  ;;  %v210_v51 = vshrl.u32 %v206_v46, 16  ;;  %v220_v48 = vadd.s32 %v218_v56, %v216_v24  ;;  %vm526_vm5 = vcmp.lt.s32.totalorder %v1216_v6, 1 }
  0xc3   :  { %vm528_vm6 = vcmp.lt.s32.totalorder %v1216_v6, 3  ;;  %vm527_vm7 = vcmp.lt.s32.totalorder %v1216_v6, 2  ;;  %v534_v50 = vsel %vm526_vm5, %v1300_v55, %v1314_v32  ;;  %v212_v36 = vshrl.u32 %v207_v34, 16 }
  0xc4   :  { %v243_v35 = vadd.s32 %v242_v49, %v232_v18  ;;  %v536_v42 = vsel %vm528_vm6, %v519_v54, %v1263_v58  ;;  %v221_v37 = vadd.s32 %v220_v48, %v210_v51  ;;  %v538_v59 = vsel %vm526_vm5, %v1314_v32, %v519_v54 }
  0xc5   :  { %v537_v46 = vsel %vm527_vm7, %v534_v50, %v536_v42  ;;  %v191_v8 = vsel %vm185_vm0, %v188_v39, %v190_v41  ;;  %v540_v4 = vsel %vm528_vm6, %v1245_v40, %v539_v20  ;;  %v1339_v58 = vadd.s32 %v237_v7, %v233_v61 }
  0xc6   :  { %v244_v11 = vadd.s32 %v243_v35, %v234_v33  ;;  %v567_v13 = vand.u32 65535, %v537_v46  ;;  %v1337_v15 = vadd.s32 %v221_v37, %v212_v36  ;;  %v541_v34 = vsel %vm527_vm7, %v538_v59, %v540_v4 }
  0xc7   :  { %v568_v9 = vshrl.u32 %v537_v46, 16  ;;  %v1344_v18 = vshrl.u32 %v1268_v60, 5  ;;  %v545_v10 = vand.u32 65535, %v541_v34  ;;  %v546_v39 = vshrl.u32 %v541_v34, 16 }
  0xc8   :  { %v248_v21 = vadd.s32 1, %v244_v11  ;;  %v245_v41 = vmul.u32 %v1198_v57, %v191_v8  ;;  %vm247_vm8 = vc.u32 %v1337_v15, %v1339_v58  ;;  %v571_v20 = vmul.u32 %v567_v13, %v1235_v22 }
  0xc9   :  { %v570_v40 = vmul.u32 %v568_v9, %v1226_v16  ;;  %v1352_v61 = vand.u32 31, %v1284_v31  ;;  %v548_v24 = vmul.u32 %v546_v39, %v1226_v16  ;;  %v549_v60 = vmul.u32 %v545_v10, %v1235_v22 }
  0xca   :  { %v249_v7 = vsel %vm247_vm8, %v248_v21, %v244_v11  ;;  %v1357_v28 = vsub.s32 32, %v1288_v38  ;;  %v510_v57 = vshrl.u32 %v1040_v27, %v1208_v0  ;;  %v547_v49 = vmul.u32 %v545_v10, %v1226_v16 }
  0xcb   :  { %v250_v56 = vadd.s32 %v249_v7, %v245_v41  ;;  %v573_v33 = vshll.u32 %v570_v40, 16  ;;  %v550_v51 = vmul.u32 %v546_v39, %v1235_v22  ;;  %v551_v48 = vshll.u32 %v548_v24, 16 }
  0xcc   :  { %v569_v35 = vmul.u32 %v567_v13, %v1226_v16  ;;  %v553_v42 = vshll.u32 %v549_v60, 16  ;;  %v572_v36 = vmul.u32 %v568_v9, %v1235_v22  ;;  %v575_v37 = vshll.u32 %v571_v20, 16 }
  0xcd   :  { %v251_v50 = vadd.s32 536870912, %v250_v56  ;;  %vm555_vm9 = vc.u32 %v547_v49, %v551_v48  ;;  %v557_v46 = vadd.s32 %v551_v48, %v547_v49  ;;  %v531_v0 = vsel %vm529_vm10, %v519_v54, 2102212464 }
  0xce   :  { %vm577_vm11 = vc.u32 %v569_v35, %v573_v33  ;;  %v579_v59 = vadd.s32 %v573_v33, %v569_v35  ;;  %v556_v11 = vsel %vm555_vm9, 1, %v1034_v2  ;;  %v674_v22 = vshll.u32 %v1037_v17, %v1288_v38 }
  0xcf   :  { %v1365_v8 = vshrl.u32 %v251_v50, 30  ;;  %v578_v4 = vsel %vm577_vm11, 1, %v1034_v2  ;;  %v558_v34 = vadd.s32 %v556_v11, %v550_v51  ;;  %vm559_vm12 = vc.u32 %v557_v46, %v553_v42 }
  0xd0   :  { %v580_v16 = vadd.s32 %v578_v4, %v572_v36  ;;  %vm581_vm13 = vc.u32 %v579_v59, %v575_v37  ;;  %v560_v9 = vsel %vm559_vm12, 1, %v1034_v2  ;;  %v552_v10 = vshrl.u32 %v548_v24, 16 }
  0xd1   :  { %v253_v13 = vshll.u32 %v1365_v8, 30  ;;  %v582_v21 = vsel %vm581_vm13, 1, %v1034_v2  ;;  %v562_v39 = vadd.s32 %v560_v9, %v558_v34  ;;  %v574_v54 = vshrl.u32 %v570_v40, 16 }
  0xd2   :  { %v584_v41 = vadd.s32 %v582_v21, %v580_v16  ;;  %v675_v7 = vshrl.u32 %v1038_v19, %v1357_v28  ;;  %v530_v49 = vsel %vm526_vm5, %v510_v57, %v1300_v55  ;;  %v532_v51 = vsel %vm528_vm6, %v1314_v32, %v531_v0 }
  0xd3   :  { %v1378_v33 = vsub.s32 %v250_v56, %v253_v13  ;;  %v554_v48 = vshrl.u32 %v549_v60, 16  ;;  %v563_v35 = vadd.s32 %v562_v39, %v552_v10  ;;  %v576_v50 = vshrl.u32 %v571_v20, 16 }
  0xd4   :  { %v585_v24 = vadd.s32 %v584_v41, %v574_v54  ;;  %v1388_v40 = vshrl.u32 %v1039_v23, %v1357_v28  ;;  %v1391_v42 = vsub.s32 32, %v1352_v61  ;;  %vm154_vm14 = vcmp.lt.s32.totalorder %v1173_v26, 0 }
  0xd5   :  { %vm255_vm10 = vcmp.lt.s32.totalorder %v1378_v33, 0  ;;  %v256_v56 = vsub.s32 0, %v1378_v33  ;;  %v533_v55 = vsel %vm527_vm7, %v530_v49, %v532_v51  ;;  %v1398_v32 = vadd.s32 %v563_v35, %v554_v48 }
  0xd6   :  { %v1400_v20 = vadd.s32 %v579_v59, %v575_v37  ;;  %v586_v60 = vadd.s32 %v585_v24, %v576_v50  ;;  %v1404_v57 = vshll.u32 %v1038_v19, %v1288_v38  ;;  %v1407_v36 = vshrl.u32 %v1284_v31, 5 }
  0xd7   :  { %v257_v46 = vsel %vm255_vm10, %v256_v56, %v1378_v33  ;;  %v1767_v0 = vand.u32 2147483647, %v1185_v44  ;;  %v1411_v11 = vor.u32 %v675_v7, %v674_v22  ;;  %v246_v4 = vadd.s32 %v1339_v58, %v1337_v15 }
  0xd8   :  { %v258_v6 = vclz %v257_v46  ;;  %vm589_vm15 = vc.u32 %v1398_v32, %v1400_v20  ;;  %v590_v37 = vadd.s32 1, %v586_v60  ;;  %v679_v59 = vor.u32 %v1388_v40, %v1404_v57 }
  0xd9   :  { %v276_v31 = vsub.s32 4, %v1365_v8  ;;  %v587_v34 = vmul.u32 %v1205_v63, %v533_v55  ;;  %vm683_vm0 = vcmp.lt.s32.totalorder %v1344_v18, 4  ;;  %v324_v13 = vshrl.u32 %v1035_v12, %v1391_v42 }
  0xda   :  { %v910_v16 = vadd.s32 4294967294, %v258_v6  ;;  %v591_v22 = vsel %vm589_vm15, %v590_v37, %v586_v60  ;;  %v327_v9 = vshrl.u32 %v1036_v14, %v1391_v42  ;;  %vm1428_vm1 = vcmp.le.f32.partialorder %v152_v29, 0.7853982 }
  0xdb   :  { %v592_v15 = vadd.s32 %v591_v22, %v587_v34  ;;  %v313_v63 = vand.u32 8388607, %v1767_v0  ;;  %v323_v58 = vshll.u32 %v1040_v27, %v1352_v61  ;;  %v326_v10 = vshll.u32 %v1035_v12, %v1352_v61 }
  0xdc   :  { %vm911_vm2 = vcmp.lt.s32.totalorder %v910_v16, 0  ;;  %v329_v39 = vshll.u32 %v1036_v14, %v1352_v61  ;;  %v330_v29 = vshrl.u32 %v1037_v17, %v1391_v42  ;;  %v333_v54 = vshrl.u32 %v1038_v19, %v1391_v42 }
  0xdd   :  { %v261_v41 = vsel %vm911_vm2, 0, %v910_v16  ;;  %v593_v7 = vadd.s32 536870912, %v592_v15  ;;  %v332_v49 = vshll.u32 %v1037_v17, %v1352_v61  ;;  %v336_v51 = vshrl.u32 %v1039_v23, %v1391_v42 }
  0xde   :  { %v262_v48 = vsub.s32 32, %v261_v41  ;;  %v266_v35 = vsub.s32 4294967266, %v261_v41  ;;  %v325_v50 = vor.u32 %v324_v13, %v323_v58  ;;  %v1448_v24 = vor.u32 %v327_v9, %v326_v10 }
  0xdf   :  { %v277_v40 = vsel %vm154_vm14, %v276_v31, %v1365_v8  ;;  %v1453_v56 = vshrl.u32 %v593_v7, 30  ;;  %v334_v55 = vor.u32 %v333_v54, %v332_v49  ;;  %v335_v60 = vshll.u32 %v1038_v19, %v1352_v61 }
  0xe0   :  { %v263_v57 = vshll.u32 %v1378_v33, %v261_v41  ;;  %v264_v46 = vshrl.u32 %v246_v4, %v262_v48  ;;  %v267_v6 = vadd.s32 127, %v266_v35  ;;  %v331_v23 = vor.u32 %v330_v29, %v329_v39 }
  0xe1   :  { %v595_v37 = vshll.u32 %v1453_v56, 30  ;;  %v314_v34 = vor.u32 8388608, %v313_v63  ;;  %v337_v16 = vor.u32 %v336_v51, %v335_v60  ;;  %vm338_vm3 = vcmp.lt.s32.totalorder %v1407_v36, 1 }
  0xe2   :  { %v265_v22 = vor.u32 %v264_v46, %v263_v57  ;;  %v268_v13 = vshll.u32 %v267_v6, 23  ;;  %vm341_vm4 = vcmp.lt.s32.totalorder %v1407_v36, 4  ;;  %v346_v8 = vsel %vm338_vm3, %v325_v50, %v1448_v24 }
  0xe3   :  { %v1467_v19 = vsel %vm683_vm0, %v1411_v11, 920167782  ;;  %v1469_v61 = vsub.s32 %v592_v15, %v595_v37  ;;  %vm340_vm5 = vcmp.lt.s32.totalorder %v1407_v36, 3  ;;  %v347_v33 = vsel %vm341_vm4, %v334_v55, 920167782 }
  0xe4   :  { %v269_v4 = vor.u32 4788187, %v268_v13  ;;  %v279_v31 = vsel %vm1428_vm1, 0, %v277_v40  ;;  %vm339_vm6 = vcmp.lt.s32.totalorder %v1407_v36, 2  ;;  %v348_v9 = vsel %vm340_vm5, %v331_v23, %v347_v33 }
  0xe5   :  { %v272_v63 = vcvt.s32.f32 %v265_v22  ;;  %vm597_vm7 = vcmp.lt.s32.totalorder %v1469_v61, 0  ;;  %v598_v15 = vsub.s32 0, %v1469_v61  ;;  %v1483_v58 = vsel %vm339_vm6, %v346_v8, %v348_v9 }
  0xe6   :  { %v270_v10 = vand.u32 2147483647, %v269_v4  ;;  %v350_v39 = vsel %vm338_vm3, %v1448_v24, %v331_v23  ;;  %v351_v29 = vsel %vm341_vm4, %v337_v16, 1326507024  ;;  %v1490_v54 = vshll.u32 %v314_v34, 8 }
  0xe7   :  { %v1494_v41 = vsel %vm683_vm0, %v679_v59, 1326507024  ;;  %v1496_v7 = vand.u32 3, %v279_v31  ;;  %v599_v49 = vsel %vm597_vm7, %v598_v15, %v1469_v61  ;;  %v322_v51 = vshrl.u32 %v1040_v27, %v1391_v42 }
  0xe8   :  { %v273_v48 = vmul.f32 %v272_v63, %v270_v10  ;;  %v588_v35 = vadd.s32 %v1400_v20, %v1398_v32  ;;  %v600_v40 = vclz %v599_v49  ;;  %v352_v60 = vsel %vm340_vm5, %v334_v55, %v351_v29 }
  0xe9   :  { %v353_v57 = vsel %vm339_vm6, %v350_v39, %v352_v60  ;;  %v355_v59 = vand.u32 65535, %v1490_v54  ;;  %v379_v46 = vand.u32 65535, %v1483_v58  ;;  %v380_v6 = vshrl.u32 %v1483_v58, 16 }
  0xea   :  { %v274_v37 = vxor.u32 2147483648, %v273_v48  ;;  %v918_v34 = vadd.s32 4294967294, %v600_v40  ;;  %v357_v42 = vand.u32 65535, %v353_v57  ;;  %v358_v16 = vshrl.u32 %v353_v57, 16 }
  0xeb   :  { %v618_v22 = vsub.s32 4, %v1453_v56  ;;  %v1513_v32 = vsel %vm338_vm3, %v322_v51, %v325_v50  ;;  %v343_v20 = vsel %vm341_vm4, %v331_v23, 2102212464  ;;  %v356_v55 = vshrl.u32 %v1490_v54, 16  ;;  %v1537_v51 = vpop.permute.xlu2 %84 }
  0xec   :  { %v275_v13 = vsel %vm154_vm14, %v274_v37, %v273_v48  ;;  %vm919_vm8 = vcmp.lt.s32.totalorder %v918_v34, 0  ;;  %v360_v8 = vmul.u32 %v358_v16, %v355_v59  ;;  %v381_v33 = vmul.u32 %v379_v46, %v355_v59 }
  0xed   :  { %v1523_v4 = vsel %vm1428_vm1, %v1173_v26, %v275_v13  ;;  %v603_v31 = vsel %vm919_vm8, 0, %v918_v34  ;;  %v1525_v9 = vmul.u32 %v357_v42, %v356_v55  ;;  %v1529_v50 = vmul.u32 %v380_v6, %v355_v59 }
  0xee   :  { %v280_v23 = vmul.f32 %v1523_v4, %v1523_v4  ;;  %v604_v63 = vsub.s32 32, %v603_v31  ;;  %v608_v15 = vsub.s32 4294967266, %v603_v31  ;;  %v1533_v10 = vmul.u32 %v379_v46, %v356_v55 }
  0xef   :  { %v605_v39 = vshll.u32 %v1469_v61, %v603_v31  ;;  %v359_v29 = vmul.u32 %v357_v42, %v355_v59  ;;  %v363_v21 = vshll.u32 %v360_v8, 16  ;;  %v365_v49 = vshll.u32 %v1525_v9, 16 }
  0xf0   :  { %v281_v48 = vmul.f32 -0.001358992, %v280_v23  ;;  %v288_v40 = vmul.f32 -0.00019511016, %v280_v23  ;;  %v606_v60 = vshrl.u32 %v588_v35, %v604_v63  ;;  %v609_v57 = vadd.s32 127, %v608_v15 }
  0xf1   :  { %v70_v37 = vlaneseq  ;;  %vm367_vm9 = vc.u32 %v359_v29, %v363_v21  ;;  %v369_v34 = vadd.s32 %v363_v21, %v359_v29  ;;  %v385_v13 = vshll.u32 %v1529_v50, 16 }
  0xf2   :  { %v282_v62 = vadd.f32 0.041655596, %v281_v48  ;;  %v289_v46 = vadd.f32 0.008332121, %v288_v40  ;;  %vm496_vm11 = vcmp.lt.s32.totalorder %v1171_v25, 0  ;;  %v607_v61 = vor.u32 %v606_v60, %v605_v39 }
  0xf3   :  { %v610_v59 = vshll.u32 %v609_v57, 23  ;;  %v1541_v42 = vand.u32 127, %v70_v37  ;;  %v362_v31 = vmul.u32 %v358_v16, %v356_v55  ;;  %v368_v52 = vsel %vm367_vm9, 1, %v1034_v2  ;;  %v113_v0 = vpop.permute.xlu2 %112 }
  0xf4   :  { %vm371_vm12 = vc.u32 %v369_v34, %v365_v49  ;;  %v283_v53 = vmul.f32 %v282_v62, %v280_v23  ;;  %v290_v35 = vmul.f32 %v289_v46, %v280_v23  ;;  %vm1546_vm13 = vcmp.le.f32.partialorder %v494_v30, 0.7853982 }
  0xf5   :  { %v611_v15 = vor.u32 4788187, %v610_v59  ;;  %v614_v29 = vcvt.s32.f32 %v607_v61  ;;  %vm808_vm10 = vcmp.lt.s32.totalorder %v1541_v42, 32  ;;  %v370_v39 = vadd.s32 %v368_v52, %v362_v31 }
  0xf6   :  { %v372_v21 = vsel %vm371_vm12, 1, %v1034_v2  ;;  %v284_v48 = vadd.f32 -0.4999988, %v283_v53  ;;  %v291_v16 = vadd.f32 -0.16666654, %v290_v35  ;;  %vm389_vm14 = vc.u32 %v381_v33, %v385_v13 }
  0xf7   :  { %v612_v40 = vand.u32 2147483647, %v611_v15  ;;  %v1041_v49 = vmov 0.0   ;;  %v344_v30 = vsel %vm340_vm5, %v1448_v24, %v343_v20  ;;  %v364_v60 = vshrl.u32 %v360_v8, 16 }
  0xf8   :  { %v1552_v62 = vsel %vm808_vm10, 1.0, %v1041_v49  ;;  %v374_v57 = vadd.s32 %v372_v21, %v370_v39  ;;  %v285_v37 = vmul.f32 %v284_v48, %v280_v23  ;;  %v292_v34 = vmul.f32 %v291_v16, %v280_v23 }
  0xf9   :  { %v615_v46 = vmul.f32 %v614_v29, %v612_v40  ;;  %v384_v52 = vmul.u32 %v380_v6, %v356_v55  ;;  %v387_v53 = vshll.u32 %v1533_v10, 16  ;;  %v390_v59 = vsel %vm389_vm14, 1, %v1034_v2 }
  0xfa   :  { %v375_v61 = vadd.s32 %v374_v57, %v364_v60  ;;  %v391_v31 = vadd.s32 %v385_v13, %v381_v33  ;;  %v286_v35 = vadd.f32 1.0, %v285_v37  ;;  %v293_v15 = vadd.f32 1.0, %v292_v34 }
  0xfb   :  { %v616_v49 = vxor.u32 2147483648, %v615_v46  ;;  %v392_v5 = vadd.s32 %v390_v59, %v384_v52  ;;  %vm297_vm15 = vcmp.lt.s32.totalorder %v1496_v7, 2  ;;  %vm298_vm1 = vcmp.eq.s32.totalorder %v1496_v7, 0 }
  0xfc   :  { %v619_v24 = vsel %vm496_vm11, %v618_v22, %v1453_v56  ;;  %vm393_vm2 = vc.u32 %v391_v31, %v387_v53  ;;  %v294_v58 = vmul.f32 %v293_v15, %v1523_v4  ;;  %v366_v20 = vshrl.u32 %v1525_v9, 16 }
  0xfd   :  { %v617_v6 = vsel %vm496_vm11, %v616_v49, %v615_v46  ;;  %v394_v55 = vsel %vm393_vm2, 1, %v1034_v2  ;;  %vm295_vm3 = vweird.f32 %v1173_v26  ;;  %vm117_vm4 = vcmp.eq.s32.totalorder %v113_v0, 1 }
  0xfe   :  { %v620_v8 = vsel %vm1546_vm13, %v1171_v25, %v617_v6  ;;  %v345_v56 = vsel %vm339_vm6, %v1513_v32, %v344_v30  ;;  %v386_v22 = vshrl.u32 %v1529_v50, 16  ;;  %v396_v33 = vadd.s32 %v394_v55, %v392_v5 }
  0xff   :  { %v299_v4 = vxor.u32 2147483648, %v294_v58  ;;  %v302_v23 = vxor.u32 2147483648, %v286_v35  ;;  %v622_v13 = vmul.f32 %v620_v8, %v620_v8  ;;  %v1581_v9 = vadd.s32 %v375_v61, %v366_v20 }
 0x100   :  { %vm301_vm5 = vcmp.eq.s32.totalorder %v1496_v7, 2  ;;  %v388_v29 = vshrl.u32 %v1533_v10, 16  ;;  %v397_v39 = vadd.s32 %v396_v33, %v386_v22  ;;  %v648_v21 = vand.u32 2147483647, %v1183_v43 }
 0x101   :  { %v300_v48 = vsel %vm298_vm1, %v286_v35, %v299_v4  ;;  %v623_v36 = vmul.f32 -0.001358992, %v622_v13  ;;  %v630_v32 = vmul.f32 -0.00019511016, %v622_v13  ;;  %v1588_v16 = vadd.s32 %v391_v31, %v387_v53 }
 0x102   :  { %v621_v5 = vsel %vm1546_vm13, 0, %v619_v24  ;;  %vm72_vm6 = vcmp.eq.s32.totalorder %v1541_v42, 0  ;;  %v398_v50 = vadd.s32 %v397_v39, %v388_v29  ;;  %v399_v40 = vmul.u32 %v1490_v54, %v345_v56 }
 0x103   :  { %v303_v30 = vsel %vm301_vm5, %v302_v23, %v294_v58  ;;  %v624_v10 = vadd.f32 0.041655596, %v623_v36  ;;  %v631_v60 = vadd.f32 0.008332121, %v630_v32  ;;  %vm401_vm7 = vc.u32 %v1581_v9, %v1588_v16 }
 0x104   :  { %v304_v57 = vsel %vm297_vm15, %v300_v48, %v303_v30  ;;  %v402_v37 = vadd.s32 1, %v398_v50  ;;  %v655_v34 = vand.u32 8388607, %v648_v21  ;;  %v666_v63 = vshrl.u32 %v1035_v12, %v1357_v28 }
 0x105   :  { %v625_v46 = vmul.f32 %v624_v10, %v622_v13  ;;  %v632_v52 = vmul.f32 %v631_v60, %v622_v13  ;;  %v665_v54 = vshll.u32 %v1040_v27, %v1288_v38  ;;  %v668_v61 = vshll.u32 %v1035_v12, %v1288_v38 }
 0x106   :  { %v403_v53 = vsel %vm401_vm7, %v402_v37, %v398_v50  ;;  %v669_v7 = vshrl.u32 %v1036_v14, %v1357_v28  ;;  %v671_v59 = vshll.u32 %v1036_v14, %v1288_v38  ;;  %v672_v31 = vshrl.u32 %v1037_v17, %v1357_v28 }
 0x107   :  { %v305_v35 = vsel %vm295_vm3, nan, %v304_v57  ;;  %v626_v15 = vadd.f32 -0.4999988, %v625_v46  ;;  %v633_v49 = vadd.f32 -0.16666654, %v632_v52  ;;  %v404_v24 = vadd.s32 %v403_v53, %v399_v40 }
 0x108   :  { %v656_v58 = vor.u32 8388608, %v655_v34  ;;  %v1614_v6 = vor.u32 %v666_v63, %v665_v54  ;;  %v1616_v12 = vor.u32 %v669_v7, %v668_v61  ;;  %v1618_v20 = vor.u32 %v672_v31, %v671_v59 }
 0x109   :  { %v627_v55 = vmul.f32 %v626_v15, %v622_v13  ;;  %v634_v56 = vmul.f32 %v633_v49, %v622_v13  ;;  %v120_v14 = vsel %vm117_vm4, %v119_v1, %v1252_v47  ;;  %v405_v17 = vadd.s32 536870912, %v404_v24 }
 0x10a   :  { %v638_v38 = vand.u32 3, %v621_v5  ;;  %v462_v22 = vsel %vm72_vm6, %v907_v3, %v305_v35  ;;  %vm680_vm8 = vcmp.lt.s32.totalorder %v1344_v18, 1  ;;  %vm682_vm9 = vcmp.lt.s32.totalorder %v1344_v18, 3 }
 0x10b   :  { %v628_v33 = vadd.f32 1.0, %v627_v55  ;;  %v635_v4 = vadd.f32 1.0, %v634_v56  ;;  %v1630_v23 = vshrl.u32 %v405_v17, 30  ;;  %v692_v47 = vsel %vm680_vm8, %v1616_v12, %v1618_v20 }
 0x10c   :  { %v688_v26 = vsel %vm680_vm8, %v1614_v6, %v1616_v12  ;;  %v690_v3 = vsel %vm682_vm9, %v1618_v20, %v1467_v19  ;;  %v694_v0 = vsel %vm682_vm9, %v1411_v11, %v1494_v41  ;;  %v1648_v13 = vshll.u32 %v656_v58, 8 }
 0x10d   :  { %v636_v29 = vmul.f32 %v635_v4, %v620_v8  ;;  %v644_v39 = vxor.u32 2147483648, %v628_v33  ;;  %v407_v48 = vshll.u32 %v1630_v23, 30  ;;  %vm681_vm11 = vcmp.lt.s32.totalorder %v1344_v18, 2 }
 0x10e   :  { %vm639_vm12 = vcmp.lt.s32.totalorder %v638_v38, 2  ;;  %vm640_vm13 = vcmp.eq.s32.totalorder %v638_v38, 0  ;;  %vm643_vm10 = vcmp.eq.s32.totalorder %v638_v38, 2  ;;  %v695_v36 = vsel %vm681_vm11, %v692_v47, %v694_v0 }
 0x10f   :  { %v641_v19 = vxor.u32 2147483648, %v636_v29  ;;  %v804_v32 = vadd.f32 %v462_v22, %v120_v14  ;;  %v408_v5 = vsub.s32 %v404_v24, %v407_v48  ;;  %v691_v11 = vsel %vm681_vm11, %v688_v26, %v690_v3 }
 0x110   :  { %v697_v41 = vand.u32 65535, %v1648_v13  ;;  %v698_v8 = vshrl.u32 %v1648_v13, 16  ;;  %v699_v50 = vand.u32 65535, %v695_v36  ;;  %v700_v40 = vshrl.u32 %v695_v36, 16 }
 0x111   :  { %v642_v30 = vsel %vm640_vm13, %v628_v33, %v641_v19  ;;  %v645_v10 = vsel %vm643_vm10, %v644_v39, %v636_v29  ;;  %vm409_vm14 = vcmp.lt.s32.totalorder %v408_v5, 0  ;;  %v410_v60 = vsub.s32 0, %v408_v5 }
 0x112   :  { %vm637_vm15 = vweird.f32 %v1171_v25  ;;  %v646_v57 = vsel %vm639_vm12, %v642_v30, %v645_v10  ;;  %v702_v37 = vmul.u32 %v700_v40, %v697_v41  ;;  %v722_v34 = vshrl.u32 %v691_v11, 16 }
 0x113   :  { %v647_v63 = vsel %vm637_vm15, nan, %v646_v57  ;;  %v411_v46 = vsel %vm409_vm14, %v410_v60, %v408_v5  ;;  %v703_v52 = vmul.u32 %v699_v50, %v698_v8  ;;  %v721_v54 = vand.u32 65535, %v691_v11 }
 0x114   :  { %v1772_v61 = vclamps-f32 %v1171_v25, 100.0  ;;  %v412_v7 = vclz %v411_v46  ;;  %v400_v31 = vadd.s32 %v1588_v16, %v1581_v9  ;;  %v701_v35 = vmul.u32 %v699_v50, %v697_v41 }
 0x115   :  { %v705_v15 = vshll.u32 %v702_v37, 16  ;;  %v664_v24 = vshrl.u32 %v1040_v27, %v1357_v28  ;;  %v704_v58 = vmul.u32 %v700_v40, %v698_v8  ;;  %v724_v55 = vmul.u32 %v722_v34, %v697_v41 }
 0x116   :  { %v802_v53 = vsel %vm72_vm6, %v1772_v61, %v647_v63  ;;  %v913_v49 = vadd.s32 4294967294, %v412_v7  ;;  %v707_v56 = vshll.u32 %v703_v52, 16  ;;  %v725_v14 = vmul.u32 %v721_v54, %v698_v8 }
 0x117   :  { %v1664_v59 = vadd.f32 %v804_v32, %v802_v53  ;;  %vm709_vm1 = vc.u32 %v701_v35, %v705_v15  ;;  %v711_v25 = vadd.s32 %v705_v15, %v701_v35  ;;  %v706_v17 = vshrl.u32 %v702_v37, 16 }
 0x118   :  { %vm914_vm2 = vcmp.lt.s32.totalorder %v913_v49, 0  ;;  %v710_v38 = vsel %vm709_vm1, 1, %v1034_v2  ;;  %v727_v22 = vshll.u32 %v724_v55, 16  ;;  %v723_v9 = vmul.u32 %v721_v54, %v697_v41 }
 0x119   :  { %v415_v33 = vsel %vm914_vm2, 0, %v913_v49  ;;  %v712_v4 = vadd.s32 %v710_v38, %v704_v58  ;;  %vm713_vm3 = vc.u32 %v711_v25, %v707_v56  ;;  %v726_v27 = vmul.u32 %v722_v34, %v698_v8 }
 0x11a   :  { %v416_v16 = vsub.s32 32, %v415_v33  ;;  %v420_v47 = vsub.s32 4294967266, %v415_v33  ;;  %v714_v26 = vsel %vm713_vm3, 1, %v1034_v2  ;;  %v729_v3 = vshll.u32 %v725_v14, 16 }
 0x11b   :  { %v716_v28 = vadd.s32 %v714_v26, %v712_v4  ;;  %vm731_vm4 = vc.u32 %v723_v9, %v727_v22  ;;  %v733_v0 = vadd.s32 %v727_v22, %v723_v9  ;;  %v417_v29 = vshll.u32 %v408_v5, %v415_v33 }
 0x11c   :  { %v418_v39 = vshrl.u32 %v400_v31, %v416_v16  ;;  %v421_v48 = vadd.s32 127, %v420_v47  ;;  %v732_v36 = vsel %vm731_vm4, 1, %v1034_v2  ;;  %v685_v19 = vsel %vm683_vm0, %v1618_v20, 2102212464 }
 0x11d   :  { %v717_v32 = vadd.s32 %v716_v28, %v706_v17  ;;  %v734_v11 = vadd.s32 %v732_v36, %v726_v27  ;;  %vm735_vm5 = vc.u32 %v733_v0, %v729_v3  ;;  %v708_v40 = vshrl.u32 %v703_v52, 16 }
 0x11e   :  { %v419_v41 = vor.u32 %v418_v39, %v417_v29  ;;  %v422_v50 = vshll.u32 %v421_v48, 23  ;;  %v736_v8 = vsel %vm735_vm5, 1, %v1034_v2  ;;  %v728_v30 = vshrl.u32 %v724_v55, 16 }
 0x11f   :  { %v738_v10 = vadd.s32 %v736_v8, %v734_v11  ;;  %v684_v5 = vsel %vm680_vm8, %v664_v24, %v1614_v6  ;;  %v686_v57 = vsel %vm682_vm9, %v1616_v12, %v685_v19  ;;  %v718_v20 = vadd.s32 %v717_v32, %v708_v40 }
 0x120   :  { %v423_v60 = vor.u32 4788187, %v422_v50  ;;  %v730_v37 = vshrl.u32 %v725_v14, 16  ;;  %v426_v46 = vcvt.s32.f32 %v419_v41  ;;  %v737_v54 = vadd.s32 %v733_v0, %v729_v3 }
 0x121   :  { %v739_v34 = vadd.s32 %v738_v10, %v728_v30  ;;  %v687_v2 = vsel %vm681_vm11, %v684_v5, %v686_v57  ;;  %vm308_vm7 = vcmp.lt.s32.totalorder %v1185_v44, 0  ;;  %v1773_v15 = vand.u32 2147483647, %v1185_v44 }
 0x122   :  { %v424_v63 = vand.u32 2147483647, %v423_v60  ;;  %vm743_vm0 = vc.u32 %v718_v20, %v737_v54  ;;  %v741_v6 = vmul.u32 %v1648_v13, %v687_v2  ;;  %v742_v26 = vadd.s32 %v737_v54, %v718_v20 }
 0x123   :  { %v740_v52 = vadd.s32 %v739_v34, %v730_v37  ;;  %vm1691_vm8 = vcmp.le.f32.partialorder %v1773_v15, 0.7853982  ;;  %v430_v41 = vsub.s32 4, %v1630_v23  ;;  %vm650_vm12 = vcmp.lt.s32.totalorder %v1183_v43, 0 }
 0x124   :  { %v427_v61 = vmul.f32 %v426_v46, %v424_v63  ;;  %vm1707_vm13 = vcmp.le.f32.partialorder %v648_v21, 0.7853982  ;;  %vm87_vm1 = vcmp.eq.s32.totalorder %v1537_v51, 1  ;;  %vm449_vm2 = vweird.f32 %v1185_v44 }
 0x125   :  { %v744_v53 = vadd.s32 1, %v740_v52  ;;  %v431_v60 = vsel %vm308_vm7, %v430_v41, %v1630_v23  ;;  %v908_v51 = vclamps-f32 %v1185_v44, 100.0 }
 0x126   :  { %v428_v7 = vxor.u32 2147483648, %v427_v61  ;;  %v433_v20 = vsel %vm1691_vm8, 0, %v431_v60 }
 0x127   :  { %v745_v31 = vsel %vm743_vm0, %v744_v53, %v740_v52  ;;  %v450_v2 = vand.u32 3, %v433_v20 }
 0x128   :  { %v429_v12 = vsel %vm308_vm7, %v428_v7, %v427_v61  ;;  %v746_v35 = vadd.s32 %v745_v31, %v741_v6 }
 0x129   :  { %v432_v18 = vsel %vm1691_vm8, %v1185_v44, %v429_v12  ;;  %vm452_vm10 = vcmp.eq.s32.totalorder %v450_v2, 0  ;;  %vm455_vm14 = vcmp.eq.s32.totalorder %v450_v2, 2  ;;  %vm451_vm15 = vcmp.lt.s32.totalorder %v450_v2, 2 }
 0x12a   :  { %v747_v24 = vadd.s32 536870912, %v746_v35  ;;  %v434_v13 = vmul.f32 %v432_v18, %v432_v18  ;;  %vm791_vm8 = vweird.f32 %v1183_v43 }
 0x12c   :  { %v748_v58 = vshrl.u32 %v747_v24, 30  ;;  %v442_v25 = vmul.f32 -0.00019511016, %v434_v13  ;;  %v435_v33 = vmul.f32 -0.001358992, %v434_v13 }
 0x12e   :  { %v749_v55 = vshll.u32 %v748_v58, 30  ;;  %v443_v38 = vadd.f32 0.008332121, %v442_v25  ;;  %v436_v47 = vadd.f32 0.041655596, %v435_v33  ;;  %v772_v7 = vsub.s32 4, %v748_v58 }
 0x130   :  { %v750_v56 = vsub.s32 %v746_v35, %v749_v55  ;;  %v444_v9 = vmul.f32 %v443_v38, %v434_v13  ;;  %v437_v48 = vmul.f32 %v436_v47, %v434_v13  ;;  %v773_v49 = vsel %vm650_vm12, %v772_v7, %v748_v58  ;;  %v116_v38 = vpop.permute.xlu0 %115 }
 0x131   :  { %v775_v25 = vsel %vm1707_vm13, 0, %v773_v49  ;;  %v1778_v58 = vperm.slane %v1190_v45, 0  ;;  %vm118_vm4 = vcmp.eq.s32.totalorder %v116_v38, 1 }
 0x132   :  { %vm751_vm9 = vcmp.lt.s32.totalorder %v750_v56, 0  ;;  %v752_v14 = vsub.s32 0, %v750_v56  ;;  %v445_v3 = vadd.f32 -0.16666654, %v444_v9  ;;  %v438_v50 = vadd.f32 -0.4999988, %v437_v48 }
 0x133   :  { %v1779_v9 = vperm.slane %v1190_v45, 1  ;;  %v792_v47 = vand.u32 3, %v775_v25 }
 0x134   :  { %v753_v17 = vsel %vm751_vm9, %v752_v14, %v750_v56  ;;  %v446_v32 = vmul.f32 %v445_v3, %v434_v13  ;;  %v439_v5 = vmul.f32 %v438_v50, %v434_v13  ;;  %v1780_v3 = vperm.slane %v1190_v45, 2 }
 0x135   :  { %v754_v22 = vclz %v753_v17  ;;  %vm794_vm5 = vcmp.eq.s32.totalorder %v792_v47, 0  ;;  %vm797_vm0 = vcmp.eq.s32.totalorder %v792_v47, 2  ;;  %vm793_vm7 = vcmp.lt.s32.totalorder %v792_v47, 2 }
 0x136   :  { %v447_v30 = vadd.f32 1.0, %v446_v32  ;;  %v440_v46 = vadd.f32 1.0, %v439_v5 }
 0x137   :  { %v921_v4 = vadd.s32 4294967294, %v754_v22 }
 0x138   :  { %v448_v37 = vmul.f32 %v447_v30, %v432_v18  ;;  %v456_v6 = vxor.u32 2147483648, %v440_v46 }
 0x139   :  { %vm922_vm11 = vcmp.lt.s32.totalorder %v921_v4, 0 }
 0x13a   :  { %v757_v16 = vsel %vm922_vm11, 0, %v921_v4  ;;  %v453_v52 = vxor.u32 2147483648, %v448_v37  ;;  %v457_v18 = vsel %vm455_vm14, %v456_v6, %v448_v37 }
 0x13b   :  { %v758_v27 = vsub.s32 32, %v757_v16  ;;  %v762_v28 = vsub.s32 4294967266, %v757_v16  ;;  %v759_v0 = vshll.u32 %v750_v56, %v757_v16  ;;  %v101_v56 = vpop.permute.xlu1 %100  ;;  %v91_v16 = vsel %vm87_vm1, %v1779_v9, %v1778_v58 }
 0x13c   :  { %v454_v12 = vsel %vm452_vm10, %v440_v46, %v453_v52  ;;  %vm103_vm3 = vcmp.eq.s32.totalorder %v101_v56, 1 }
 0x13d   :  { %v760_v29 = vshrl.u32 %v742_v26, %v758_v27  ;;  %v763_v39 = vadd.s32 127, %v762_v28  ;;  %v458_v55 = vsel %vm451_vm15, %v454_v12, %v457_v18 }
 0x13e   :  { %v459_v22 = vsel %vm449_vm2, nan, %v458_v55 }
 0x13f   :  { %v761_v36 = vor.u32 %v760_v29, %v759_v0  ;;  %v764_v19 = vshll.u32 %v763_v39, 23  ;;  %v463_v28 = vsel %vm72_vm6, %v908_v51, %v459_v22  ;;  %v106_v0 = vsel %vm103_vm3, %v1780_v3, %v91_v16 }
 0x140   :  { %v121_v39 = vsel %vm118_vm4, %v119_v1, %v106_v0 }
 0x141   :  { %v765_v11 = vor.u32 4788187, %v764_v19  ;;  %v768_v8 = vcvt.s32.f32 %v761_v36  ;;  %v805_v44 = vadd.f32 %v463_v28, %v121_v39  ;;  %v916_v19 = vclamps-f32 %v1183_v43, 100.0 }
 0x143   :  { %v766_v40 = vand.u32 2147483647, %v765_v11 }
 0x145   :  { %v769_v10 = vmul.f32 %v768_v8, %v766_v40 }
 0x147   :  { %v770_v57 = vxor.u32 2147483648, %v769_v10 }
 0x149   :  { %v771_v63 = vsel %vm650_vm12, %v770_v57, %v769_v10 }
 0x14a   :  { %v774_v23 = vsel %vm1707_vm13, %v1183_v43, %v771_v63 }
 0x14b   :  { %v776_v54 = vmul.f32 %v774_v23, %v774_v23 }
 0x14d   :  { %v777_v61 = vmul.f32 -0.001358992, %v776_v54  ;;  %v784_v53 = vmul.f32 -0.00019511016, %v776_v54 }
 0x14f   :  { %v778_v31 = vadd.f32 0.041655596, %v777_v61  ;;  %v785_v21 = vadd.f32 0.008332121, %v784_v53 }
 0x151   :  { %v779_v35 = vmul.f32 %v778_v31, %v776_v54  ;;  %v786_v15 = vmul.f32 %v785_v21, %v776_v54 }
 0x153   :  { %v780_v24 = vadd.f32 -0.4999988, %v779_v35  ;;  %v787_v13 = vadd.f32 -0.16666654, %v786_v15 }
 0x155   :  { %v781_v14 = vmul.f32 %v780_v24, %v776_v54  ;;  %v788_v17 = vmul.f32 %v787_v13, %v776_v54 }
 0x157   :  { %v782_v33 = vadd.f32 1.0, %v781_v14  ;;  %v789_v4 = vadd.f32 1.0, %v788_v17 }
 0x159   :  { %v790_v26 = vmul.f32 %v789_v4, %v774_v23  ;;  %v798_v27 = vxor.u32 2147483648, %v782_v33 }
 0x15b   :  { %v795_v29 = vxor.u32 2147483648, %v790_v26  ;;  %v799_v36 = vsel %vm797_vm0, %v798_v27, %v790_v26 }
 0x15d   :  { %v796_v48 = vsel %vm794_vm5, %v782_v33, %v795_v29 }
 0x15e   :  { %v800_v32 = vsel %vm793_vm7, %v796_v48, %v799_v36 }
 0x15f   :  { %v801_v11 = vsel %vm791_vm8, nan, %v800_v32 }
 0x160   :  { %v803_v41 = vsel %vm72_vm6, %v916_v19, %v801_v11 }
 0x161   :  { %v807_v50 = vadd.f32 %v805_v44, %v803_v41 }
 0x162   :  { %1024 = dma.done.wait [#allocation3], 256 }
 0x163   :  { %1025 = vsyncadd [#allocation3], 4294967040  ;;  %v814_v40 = vld [vmem:[#allocation2] sm:$0xff]  ;;  %v815_v1 = vld [vmem:[#allocation2 + $0x8] sm:$0xff]  ;;  %s882_s27 = sshll.u32 %s1763_s12, 4  ;;  %s1044_s0 = smov 8   ;;  %s883_s27 = int_to_ptr.hbm [resolvable:$true] %s882_s27 }
 0x164   :  { %v816_v45 = vadd.f32 %v814_v40, %v1664_v59  ;;  %v817_v30 = vadd.f32 %v815_v1, %v807_v50  ;;  %v952_v15 = vld [vmem:[%s1761_s10] ss:$0 sm:$0xff]  ;;  %s1042_s10 = smov [#allocation6]  }
 0x165   :  { %v953_v13 = vld [vmem:[%s1762_s11] ss:$0 sm:$0xff]  ;;  %s880_s23 = sshll.u32 %s1042_s10, 4  ;;  %s1043_s11 = smov 128   ;;  %s881_s23 = int_to_ptr.vmem [resolvable:$true] %s880_s23 }
 0x166   :  { %v818_v8 = vmul.f32 %v1552_v62, %v816_v45  ;;  %v819_v10 = vmul.f32 %v1552_v62, %v817_v30 }
 0x168   :  { %820 = vadd.xlane.f32.xlu0 %v818_v8 }
 0x170   :  { %822 = vadd.xlane.f32.xlu0 %v819_v10 }
 0x1db   :  { %v821_v43 = vpop.xlane.xlu0 %820 }
 0x1dc   :  { %v824_v60 = vmul.f32 0.03125, %v821_v43 }
 0x1de   :  { %v826_v5 = vsub.f32 %v818_v8, %v824_v60 }
 0x1e0   :  { %v828_v42 = vmul.f32 %v1552_v62, %v826_v5 }
 0x1e2   :  { %v830_v57 = vmul.f32 %v828_v42, %v828_v42 }
 0x1e3   :  { %v823_v20 = vpop.xlane.xlu0 %822 }
 0x1e4   :  { %v825_v37 = vmul.f32 0.03125, %v823_v20  ;;  %832 = vadd.xlane.f32.xlu1 %v830_v57 }
 0x1e6   :  { %v827_v34 = vsub.f32 %v819_v10, %v825_v37 }
 0x1e8   :  { %v829_v59 = vmul.f32 %v1552_v62, %v827_v34 }
 0x1ea   :  { %v831_v63 = vmul.f32 %v829_v59, %v829_v59 }
 0x1ec   :  { %834 = vadd.xlane.f32.xlu1 %v831_v63 }
 0x257   :  { %v833_v23 = vpop.xlane.xlu1 %832 }
 0x258   :  { %v836_v46 = vmul.f32 0.03125, %v833_v23 }
 0x25a   :  { %v838_v54 = vadd.f32 1e-12, %v836_v46 }
 0x25c   :  { %954 = vrsqrt.f32 %v838_v54  ;;  %vm846_vm9 = vweird.f32 %v838_v54 }
 0x25f   :  { %v835_v2 = vpop.xlane.xlu1 %834 }
 0x260   :  { %v837_v52 = vmul.f32 0.03125, %v835_v2 }
 0x262   :  { %v955_v61 = vpop.eup %954  ;;  %v839_v53 = vadd.f32 1e-12, %v837_v52 }
 0x263   :  { %v841_v7 = vmul.f32 %v955_v61, %v838_v54  ;;  %vm847_vm6 = vweird.f32 %v955_v61 }
 0x264   :  { %956 = vrsqrt.f32 %v839_v53  ;;  %vm848_vm11 = vmor %vm846_vm9, %vm847_vm6  ;;  %vm856_vm13 = vweird.f32 %v839_v53 }
 0x265   :  { %v842_v6 = vmul.f32 %v955_v61, %v841_v7 }
 0x267   :  { %v843_v31 = vmul.f32 0.5, %v842_v6 }
 0x269   :  { %v844_v21 = vsub.f32 1.5, %v843_v31 }
 0x26a   :  { %v957_v12 = vpop.eup %956 }
 0x26b   :  { %v845_v35 = vmul.f32 %v955_v61, %v844_v21  ;;  %v851_v62 = vmul.f32 %v957_v12, %v839_v53  ;;  %vm857_vm12 = vweird.f32 %v957_v12 }
 0x26c   :  { %vm858_vm10 = vmor %vm856_vm13, %vm857_vm12 }
 0x26d   :  { %v849_v49 = vsel %vm848_vm11, %v955_v61, %v845_v35  ;;  %v852_v18 = vmul.f32 %v957_v12, %v851_v62 }
 0x26e   :  { %v860_v24 = vmul.f32 %v849_v49, %v828_v42 }
 0x26f   :  { %v853_v55 = vmul.f32 0.5, %v852_v18 }
 0x270   :  { %v866_v56 = vmul.f32 %v952_v15, %v860_v24 }
 0x271   :  { %v854_v25 = vsub.f32 1.5, %v853_v55 }
 0x272   :  { %v872_v14 = vadd.f32 %v953_v13, %v866_v56 }
 0x273   :  { %v855_v17 = vmul.f32 %v957_v12, %v854_v25 }
 0x274   :  { %874 = vst [vmem:[#allocation6] sm:$0xff] %v872_v14 }
 0x275   :  { %v859_v38 = vsel %vm858_vm10, %v957_v12, %v855_v17 }
 0x276   :  { %v861_v22 = vmul.f32 %v859_v38, %v829_v59 }
 0x278   :  { %v867_v33 = vmul.f32 %v952_v15, %v861_v22 }
 0x27a   :  { %v873_v4 = vadd.f32 %v953_v13, %v867_v33 }
 0x27c   :  { %875 = vst [vmem:[#allocation6 + $0x8] sm:$0xff] %v873_v4 }
 0x27d   :  { %888 = dma.vmem_to_hbm [thread:$0]  %s881_s23, 256, %s883_s27, [#allocation7], %s1043_s11, %s1043_s11, %s1044_s0  }
 0x27e   :  { %1026 = dma.done.wait [#allocation7], 256  }
 0x27f   :  { %1027 = vsyncadd [#allocation7], 4294967040 }
 0x280   :  { %893 = vsyncpa [#allocation7], 1 }
 0x281   :  { %894 = vsyncmov [#allocation3] }
 0x284   :  { %s895_s29 = vpop.sfrf %894 }
 0x285   :  { %p924_p11 = scmp.ne.s32.totalorder %s895_s29, 0 }
 0x287   :  { %899 = shalt.err (%p924_p11)  }

</bundles_post_ra>
